<compile_context>
chip_gen: v7x
topology: tpu7x:2x2x1
jax: 0.10.0
libtpu: 0.0.40
codegen_flags: <defaults>
</compile_context>

<pallas_src>
from functools import partial

import jax
import jax.numpy as jnp
from jax.experimental import pallas as pl
from jax.experimental.pallas import tpu as pltpu

EPS = 1e-5
NUM_GROUPS = 32


def tiny_temporal_conv_kernel(x_ref, scale_ref, shift_ref, w_ref, b_ref, o_ref):
    # x_ref block: (1, F, C, THW) -- one (batch, HW-tile) per grid step, native layout.
    F_ = x_ref.shape[1]
    C = x_ref.shape[2]
    THW = x_ref.shape[3]

    x = x_ref[0]                                           # (F, C, THW) f32; also the residual

    # ---- fused GroupNorm (precomputed per-(batch,channel) scale/shift) + SiLU, one pass ----
    scale = jnp.broadcast_to(scale_ref[0], (C, THW))       # (C,1) column -> lane broadcast, hoisted
    shift = jnp.broadcast_to(shift_ref[0], (C, THW))
    y = x * scale + shift                                  # (F, C, THW)
    y = y * jax.nn.sigmoid(y)
    yb = y.astype(jnp.bfloat16)
    # TODO(synk): Dropout(p=0.0) / eval mode is the identity; no stochastic path implemented.

    # residual + conv bias
    b = jnp.broadcast_to(b_ref[...], (C, THW))
    o_ref[0] = x + b

    # ---- Conv3d(C, C, (3,1,1)) with zero temporal padding ----
    # W_cat = [w0; w1; w2] stacked over output channels: (3C, C). For each frame f,
    # z_f = W_cat @ y_f; y_f contributes tap1 to out[f], tap0 to out[f+1], tap2 to out[f-1].
    for f in range(F_):
        z = jnp.dot(w_ref[...], yb[f], preferred_element_type=jnp.float32)   # (3C, THW) f32
        o_ref[0, f] = o_ref[0, f] + z[C:2 * C]
        if f + 1 < F_:
            o_ref[0, f + 1] = o_ref[0, f + 1] + z[0:C]
        if f > 0:
            o_ref[0, f - 1] = o_ref[0, f - 1] + z[2 * C:3 * C]


def _pick_tile_hw(hw, f, c, batch, max_block_bytes=3 << 20, min_grid_steps=4):
    """Largest multiple-of-128 divisor of hw whose f32 block fits the budget; shrink further
    if the total grid would have too few steps to pipeline / fill 2 TensorCores."""
    cands = [d for d in range(hw, 0, -1) if hw % d == 0 and d % 128 == 0]
    if not cands:
        return hw  # no lane-aligned divisor; use the full dim (allowed by BlockSpec rules)
    tile = next((d for d in cands if f * d * c * 4 <= max_block_bytes), cands[-1])
    while batch * (hw // tile) < min_grid_steps:
        smaller = [d for d in cands if d < tile]
        if not smaller:
            break
        tile = smaller[0]
    return tile


@partial(jax.jit, static_argnames=("num_frames",))
def tiny_temporal_conv_layer(hidden_states, gamma, beta, weight, bias, *, num_frames):
    """hidden_states: (B*F, C, H, W) float32 (NCHW, like the PyTorch module).
       weight: (Cout, Cin, 3) Conv3d temporal taps; bias: (Cout,). Requires Cout == Cin."""
    BF, C, H, W = hidden_states.shape
    F_ = num_frames
    assert BF % F_ == 0 and C % NUM_GROUPS == 0
    B = BF // F_
    HW = H * W

    # Native kernel layout (B, F, C, HW): reshape only, no data movement.
    x = hidden_states.reshape(B, F_, C, HW).astype(jnp.float32)

    # ---- GroupNorm stats precompute (one read pass, centered variance) ----
    cg = C // NUM_GROUPS
    xg = x.reshape(B, F_, NUM_GROUPS, cg, HW)
    mean = xg.mean(axis=(1, 3, 4))                       # (B, G)
    var = xg.var(axis=(1, 3, 4))                         # (B, G), centered / two-pass
    inv = jax.lax.rsqrt(var + EPS)                       # (B, G)
    mean_c = jnp.repeat(mean, cg, axis=1)                # (B, C)
    inv_c = jnp.repeat(inv, cg, axis=1)                  # (B, C)
    g = gamma.astype(jnp.float32)[None, :]
    bta = beta.astype(jnp.float32)[None, :]
    scale = (inv_c * g).reshape(B, C, 1)
    shift = (bta - mean_c * inv_c * g).reshape(B, C, 1)

    # conv taps stacked over output channels: w_cat[k*C:(k+1)*C, :] = weight[:, :, k]  (bf16)
    w_cat = jnp.transpose(weight, (2, 0, 1)).reshape(3 * C, C).astype(jnp.bfloat16)
    bias2 = bias.reshape(C, 1).astype(jnp.float32)

    tile_hw = _pick_tile_hw(HW, F_, C, batch=B)
    grid = (B, HW // tile_hw)

    # VMEM sizing: in/out double-buffered blocks, y f32, yb bf16, per-frame z, weights, headroom.
    blk = F_ * tile_hw * C * 4
    vmem_bytes = int(min(max(6 * blk + 3 * blk // max(F_, 1) + 12 * C * C + (4 << 20),
                             16 << 20), 48 << 20))

    out = pl.pallas_call(
        tiny_temporal_conv_kernel,
        out_shape=jax.ShapeDtypeStruct((B, F_, C, HW), jnp.float32),
        grid=grid,
        in_specs=[
            pl.BlockSpec((1, F_, C, tile_hw), lambda b, h: (b, 0, 0, h)),
            pl.BlockSpec((1, C, 1), lambda b, h: (b, 0, 0)),
            pl.BlockSpec((1, C, 1), lambda b, h: (b, 0, 0)),
            pl.BlockSpec((3 * C, C), lambda b, h: (0, 0)),
            pl.BlockSpec((C, 1), lambda b, h: (0, 0)),
        ],
        out_specs=pl.BlockSpec((1, F_, C, tile_hw), lambda b, h: (b, 0, 0, h)),
        compiler_params=pltpu.CompilerParams(
            dimension_semantics=("parallel", "parallel"),
            vmem_limit_bytes=vmem_bytes,
        ),
    )(x, scale, shift, w_cat, bias2)

    # back to PyTorch output layout (B*F, C, H, W) -- reshape only.
    return out.reshape(BF, C, H, W).astype(hidden_states.dtype)


def reference(hidden_states, gamma, beta, weight, bias, num_frames):
    """Pure-JAX f32 re-implementation of the PyTorch forward (verification only)."""
    BF, C, H, W = hidden_states.shape
    B = BF // num_frames
    x = hidden_states.reshape(B, num_frames, C, H, W).transpose(0, 2, 1, 3, 4)  # (B,C,F,H,W)
    identity = x
    xg = x.reshape(B, NUM_GROUPS, C // NUM_GROUPS, num_frames, H, W)
    mean = xg.mean(axis=(2, 3, 4, 5), keepdims=True)
    var = xg.var(axis=(2, 3, 4, 5), keepdims=True)
    xn = ((xg - mean) / jnp.sqrt(var + EPS)).reshape(B, C, num_frames, H, W)
    y = xn * gamma.reshape(1, C, 1, 1, 1) + beta.reshape(1, C, 1, 1, 1)
    y = y * jax.nn.sigmoid(y)
    yp = jnp.pad(y, ((0, 0), (0, 0), (1, 1), (0, 0), (0, 0)))
    conv = sum(
        jnp.einsum('oc,bcfhw->bofhw', weight[:, :, k], yp[:, :, k:k + num_frames])
        for k in range(3)
    ) + bias.reshape(1, C, 1, 1, 1)
    out = identity + conv
    return out.transpose(0, 2, 1, 3, 4).reshape(BF, C, H, W)


if __name__ == "__main__":
    # small shapes: batch=2, frames=8, channels=32 (GroupNorm(32) needs C % 32 == 0), H=W=8
    B, F_, C, H, W = 2, 8, 32, 8, 8
    key = jax.random.PRNGKey(0)
    kx, kw, kb, kg, kbt = jax.random.split(key, 5)

    hidden_states = jax.random.normal(kx, (B * F_, C, H, W), dtype=jnp.float32)

    # non-trivial affine params to exercise the fused scale/shift path
    gamma = 1.0 + 0.1 * jax.random.normal(kg, (C,), dtype=jnp.float32)
    beta = 0.1 * jax.random.normal(kbt, (C,), dtype=jnp.float32)
    # Conv3d(C, C, (3,1,1)): the module zero-inits these; small deterministic random
    # values are used instead so the kernel's hot path is actually exercised.
    weight = 0.05 * jax.random.normal(kw, (C, C, 3), dtype=jnp.float32)  # (Cout, Cin, kT)
    bias = 0.05 * jax.random.normal(kb, (C,), dtype=jnp.float32)

    out = tiny_temporal_conv_layer(hidden_states, gamma, beta, weight, bias, num_frames=F_)
    out = jax.block_until_ready(out)

    ref = reference(hidden_states, gamma, beta, weight, bias, num_frames=F_)
    assert out.shape == (B * F_, C, H, W)
    # bf16 MXU operands (f32 accumulation) -> slightly looser tolerance than pure f32
    assert jnp.allclose(out, ref, rtol=1e-2, atol=1e-2), float(jnp.max(jnp.abs(out - ref)))

    print("KERNEL_OK")
</pallas_src>

<mosaic_0001>
module attributes {stable_mosaic.version = 11 : i64} {
  func.func @tiny_temporal_conv_kernel(%arg0: i32, %arg1: i32, %arg2: memref<1x8x32x64xf32, #tpu.memory_space<vmem>>, %arg3: memref<1x32x1xf32, #tpu.memory_space<vmem>>, %arg4: memref<1x32x1xf32, #tpu.memory_space<vmem>>, %arg5: memref<96x32xbf16, #tpu.memory_space<vmem>>, %arg6: memref<32x1xf32, #tpu.memory_space<vmem>>, %arg7: memref<1x8x32x64xf32, #tpu.memory_space<vmem>>) attributes {dimension_semantics = [#tpu.dimension_semantics<parallel>, #tpu.dimension_semantics<parallel>], iteration_bounds = array<i64: 2, 1>, scalar_prefetch = 0 : i64, scratch_operands = 0 : i64, tpu.core_type = #tpu.core_type<tc>, window_params = [{transform_indices = @transform_0, window_bounds = array<i64: 1, 8, 32, 64>}, {transform_indices = @transform_1, window_bounds = array<i64: 1, 32, 1>}, {transform_indices = @transform_2, window_bounds = array<i64: 1, 32, 1>}, {pipeline_mode = #tpu.pipeline_mode<synchronous>, transform_indices = @transform_3, window_bounds = array<i64: 96, 32>}, {pipeline_mode = #tpu.pipeline_mode<synchronous>, transform_indices = @transform_4, window_bounds = array<i64: 32, 1>}, {transform_indices = @transform_5, window_bounds = array<i64: 1, 8, 32, 64>}]} {
    %c0 = arith.constant 0 : index
    %c0_0 = arith.constant 0 : index
    %c0_1 = arith.constant 0 : index
    %c0_2 = arith.constant 0 : index
    %0 = vector.load %arg2[%c0, %c0_0, %c0_1, %c0_2] : memref<1x8x32x64xf32, #tpu.memory_space<vmem>>, vector<1x8x32x64xf32>
    %1 = vector.shape_cast %0 : vector<1x8x32x64xf32> to vector<8x32x64xf32>
    %c0_3 = arith.constant 0 : index
    %c0_4 = arith.constant 0 : index
    %c0_5 = arith.constant 0 : index
    %2 = vector.load %arg3[%c0_3, %c0_4, %c0_5] : memref<1x32x1xf32, #tpu.memory_space<vmem>>, vector<1x32x1xf32>
    %3 = vector.shape_cast %2 : vector<1x32x1xf32> to vector<32x1xf32>
    %4 = vector.shape_cast %3 : vector<32x1xf32> to vector<32x1xf32>
    %5 = vector.broadcast %4 : vector<32x1xf32> to vector<32x64xf32>
    %c0_6 = arith.constant 0 : index
    %c0_7 = arith.constant 0 : index
    %c0_8 = arith.constant 0 : index
    %6 = vector.load %arg4[%c0_6, %c0_7, %c0_8] : memref<1x32x1xf32, #tpu.memory_space<vmem>>, vector<1x32x1xf32>
    %7 = vector.shape_cast %6 : vector<1x32x1xf32> to vector<32x1xf32>
    %8 = vector.shape_cast %7 : vector<32x1xf32> to vector<32x1xf32>
    %9 = vector.broadcast %8 : vector<32x1xf32> to vector<32x64xf32>
    %10 = vector.shape_cast %5 : vector<32x64xf32> to vector<1x32x64xf32>
    %11 = vector.broadcast %10 : vector<1x32x64xf32> to vector<8x32x64xf32>
    %12 = arith.mulf %1, %11 : vector<8x32x64xf32>
    %13 = vector.shape_cast %9 : vector<32x64xf32> to vector<1x32x64xf32>
    %14 = vector.broadcast %13 : vector<1x32x64xf32> to vector<8x32x64xf32>
    %15 = arith.addf %12, %14 : vector<8x32x64xf32>
    %16 = arith.negf %15 : vector<8x32x64xf32>
    %17 = math.exp %16 : vector<8x32x64xf32>
    %cst = arith.constant 1.000000e+00 : f32
    %18 = vector.broadcast %cst : f32 to vector<8x32x64xf32>
    %19 = arith.addf %18, %17 : vector<8x32x64xf32>
    %20 = arith.divf %18, %19 : vector<8x32x64xf32>
    %21 = arith.mulf %15, %20 : vector<8x32x64xf32>
    %22 = arith.truncf %21 : vector<8x32x64xf32> to vector<8x32x64xbf16>
    %c0_9 = arith.constant 0 : index
    %c0_10 = arith.constant 0 : index
    %23 = vector.load %arg6[%c0_9, %c0_10] : memref<32x1xf32, #tpu.memory_space<vmem>>, vector<32x1xf32>
    %24 = vector.shape_cast %23 : vector<32x1xf32> to vector<32x1xf32>
    %25 = vector.broadcast %24 : vector<32x1xf32> to vector<32x64xf32>
    %26 = vector.shape_cast %25 : vector<32x64xf32> to vector<1x32x64xf32>
    %27 = vector.broadcast %26 : vector<1x32x64xf32> to vector<8x32x64xf32>
    %28 = arith.addf %1, %27 : vector<8x32x64xf32>
    %c0_11 = arith.constant 0 : index
    %c0_12 = arith.constant 0 : index
    %c0_13 = arith.constant 0 : index
    %c0_14 = arith.constant 0 : index
    %29 = vector.load %arg7[%c0_11, %c0_12, %c0_13, %c0_14] : memref<1x8x32x64xf32, #tpu.memory_space<vmem>>, vector<1x8x32x64xf32>
    %30 = vector.shape_cast %29 : vector<1x8x32x64xf32> to vector<8x32x64xf32>
    %31 = vector.shape_cast %28 : vector<8x32x64xf32> to vector<1x8x32x64xf32>
    tpu.vector_store %arg7[%c0_11, %c0_12, %c0_13, %c0_14], %31 {strides = array<i32>} : memref<1x8x32x64xf32, #tpu.memory_space<vmem>>, vector<1x8x32x64xf32>,
    %c0_15 = arith.constant 0 : index
    %c0_16 = arith.constant 0 : index
    %32 = vector.load %arg5[%c0_15, %c0_16] : memref<96x32xbf16, #tpu.memory_space<vmem>>, vector<96x32xbf16>
    %33 = vector.extract_strided_slice %22 {offsets = [0, 0, 0], sizes = [1, 32, 64], strides = [1, 1, 1]} : vector<8x32x64xbf16> to vector<1x32x64xbf16>
    %34 = vector.shape_cast %33 : vector<1x32x64xbf16> to vector<32x64xbf16>
    %cst_17 = arith.constant dense<0.000000e+00> : vector<96x64xf32>
    %35 = tpu.matmul %32, %34, %cst_17 {dimension_numbers = #tpu.dot_dimension_numbers<[1], [0], [0], [1], [0, 0, 1, 1], [], []>} : vector<96x32xbf16>, vector<32x64xbf16>, vector<96x64xf32> -> vector<96x64xf32>
    %c0_18 = arith.constant 0 : index
    %c0_19 = arith.constant 0 : index
    %c0_20 = arith.constant 0 : index
    %c0_21 = arith.constant 0 : index
    %36 = vector.load %arg7[%c0_18, %c0_19, %c0_20, %c0_21] : memref<1x8x32x64xf32, #tpu.memory_space<vmem>>, vector<1x1x32x64xf32>
    %37 = vector.shape_cast %36 : vector<1x1x32x64xf32> to vector<32x64xf32>
    %38 = vector.extract_strided_slice %35 {offsets = [32, 0], sizes = [32, 64], strides = [1, 1]} : vector<96x64xf32> to vector<32x64xf32>
    %39 = arith.addf %37, %38 : vector<32x64xf32>
    %c0_22 = arith.constant 0 : index
    %c0_23 = arith.constant 0 : index
    %c0_24 = arith.constant 0 : index
    %c0_25 = arith.constant 0 : index
    %40 = vector.load %arg7[%c0_22, %c0_23, %c0_24, %c0_25] : memref<1x8x32x64xf32, #tpu.memory_space<vmem>>, vector<1x1x32x64xf32>
    %41 = vector.shape_cast %40 : vector<1x1x32x64xf32> to vector<32x64xf32>
    %42 = vector.shape_cast %39 : vector<32x64xf32> to vector<1x1x32x64xf32>
    tpu.vector_store %arg7[%c0_22, %c0_23, %c0_24, %c0_25], %42 {strides = array<i32>} : memref<1x8x32x64xf32, #tpu.memory_space<vmem>>, vector<1x1x32x64xf32>,
    %c0_26 = arith.constant 0 : index
    %c1 = arith.constant 1 : index
    %c0_27 = arith.constant 0 : index
    %c0_28 = arith.constant 0 : index
    %43 = vector.load %arg7[%c0_26, %c1, %c0_27, %c0_28] : memref<1x8x32x64xf32, #tpu.memory_space<vmem>>, vector<1x1x32x64xf32>
    %44 = vector.shape_cast %43 : vector<1x1x32x64xf32> to vector<32x64xf32>
    %45 = vector.extract_strided_slice %35 {offsets = [0, 0], sizes = [32, 64], strides = [1, 1]} : vector<96x64xf32> to vector<32x64xf32>
    %46 = arith.addf %44, %45 : vector<32x64xf32>
    %c0_29 = arith.constant 0 : index
    %c1_30 = arith.constant 1 : index
    %c0_31 = arith.constant 0 : index
    %c0_32 = arith.constant 0 : index
    %47 = vector.load %arg7[%c0_29, %c1_30, %c0_31, %c0_32] : memref<1x8x32x64xf32, #tpu.memory_space<vmem>>, vector<1x1x32x64xf32>
    %48 = vector.shape_cast %47 : vector<1x1x32x64xf32> to vector<32x64xf32>
    %49 = vector.shape_cast %46 : vector<32x64xf32> to vector<1x1x32x64xf32>
    tpu.vector_store %arg7[%c0_29, %c1_30, %c0_31, %c0_32], %49 {strides = array<i32>} : memref<1x8x32x64xf32, #tpu.memory_space<vmem>>, vector<1x1x32x64xf32>,
    %c0_33 = arith.constant 0 : index
    %c0_34 = arith.constant 0 : index
    %50 = vector.load %arg5[%c0_33, %c0_34] : memref<96x32xbf16, #tpu.memory_space<vmem>>, vector<96x32xbf16>
    %51 = vector.extract_strided_slice %22 {offsets = [1, 0, 0], sizes = [1, 32, 64], strides = [1, 1, 1]} : vector<8x32x64xbf16> to vector<1x32x64xbf16>
    %52 = vector.shape_cast %51 : vector<1x32x64xbf16> to vector<32x64xbf16>
    %cst_35 = arith.constant dense<0.000000e+00> : vector<96x64xf32>
    %53 = tpu.matmul %50, %52, %cst_35 {dimension_numbers = #tpu.dot_dimension_numbers<[1], [0], [0], [1], [0, 0, 1, 1], [], []>} : vector<96x32xbf16>, vector<32x64xbf16>, vector<96x64xf32> -> vector<96x64xf32>
    %c0_36 = arith.constant 0 : index
    %c1_37 = arith.constant 1 : index
    %c0_38 = arith.constant 0 : index
    %c0_39 = arith.constant 0 : index
    %54 = vector.load %arg7[%c0_36, %c1_37, %c0_38, %c0_39] : memref<1x8x32x64xf32, #tpu.memory_space<vmem>>, vector<1x1x32x64xf32>
    %55 = vector.shape_cast %54 : vector<1x1x32x64xf32> to vector<32x64xf32>
    %56 = vector.extract_strided_slice %53 {offsets = [32, 0], sizes = [32, 64], strides = [1, 1]} : vector<96x64xf32> to vector<32x64xf32>
    %57 = arith.addf %55, %56 : vector<32x64xf32>
    %c0_40 = arith.constant 0 : index
    %c1_41 = arith.constant 1 : index
    %c0_42 = arith.constant 0 : index
    %c0_43 = arith.constant 0 : index
    %58 = vector.load %arg7[%c0_40, %c1_41, %c0_42, %c0_43] : memref<1x8x32x64xf32, #tpu.memory_space<vmem>>, vector<1x1x32x64xf32>
    %59 = vector.shape_cast %58 : vector<1x1x32x64xf32> to vector<32x64xf32>
    %60 = vector.shape_cast %57 : vector<32x64xf32> to vector<1x1x32x64xf32>
    tpu.vector_store %arg7[%c0_40, %c1_41, %c0_42, %c0_43], %60 {strides = array<i32>} : memref<1x8x32x64xf32, #tpu.memory_space<vmem>>, vector<1x1x32x64xf32>,
    %c0_44 = arith.constant 0 : index
    %c2 = arith.constant 2 : index
    %c0_45 = arith.constant 0 : index
    %c0_46 = arith.constant 0 : index
    %61 = vector.load %arg7[%c0_44, %c2, %c0_45, %c0_46] : memref<1x8x32x64xf32, #tpu.memory_space<vmem>>, vector<1x1x32x64xf32>
    %62 = vector.shape_cast %61 : vector<1x1x32x64xf32> to vector<32x64xf32>
    %63 = vector.extract_strided_slice %53 {offsets = [0, 0], sizes = [32, 64], strides = [1, 1]} : vector<96x64xf32> to vector<32x64xf32>
    %64 = arith.addf %62, %63 : vector<32x64xf32>
    %c0_47 = arith.constant 0 : index
    %c2_48 = arith.constant 2 : index
    %c0_49 = arith.constant 0 : index
    %c0_50 = arith.constant 0 : index
    %65 = vector.load %arg7[%c0_47, %c2_48, %c0_49, %c0_50] : memref<1x8x32x64xf32, #tpu.memory_space<vmem>>, vector<1x1x32x64xf32>
    %66 = vector.shape_cast %65 : vector<1x1x32x64xf32> to vector<32x64xf32>
    %67 = vector.shape_cast %64 : vector<32x64xf32> to vector<1x1x32x64xf32>
    tpu.vector_store %arg7[%c0_47, %c2_48, %c0_49, %c0_50], %67 {strides = array<i32>} : memref<1x8x32x64xf32, #tpu.memory_space<vmem>>, vector<1x1x32x64xf32>,
    %c0_51 = arith.constant 0 : index
    %c0_52 = arith.constant 0 : index
    %c0_53 = arith.constant 0 : index
    %c0_54 = arith.constant 0 : index
    %68 = vector.load %arg7[%c0_51, %c0_52, %c0_53, %c0_54] : memref<1x8x32x64xf32, #tpu.memory_space<vmem>>, vector<1x1x32x64xf32>
    %69 = vector.shape_cast %68 : vector<1x1x32x64xf32> to vector<32x64xf32>
    %70 = vector.extract_strided_slice %53 {offsets = [64, 0], sizes = [32, 64], strides = [1, 1]} : vector<96x64xf32> to vector<32x64xf32>
    %71 = arith.addf %69, %70 : vector<32x64xf32>
    %c0_55 = arith.constant 0 : index
    %c0_56 = arith.constant 0 : index
    %c0_57 = arith.constant 0 : index
    %c0_58 = arith.constant 0 : index
    %72 = vector.load %arg7[%c0_55, %c0_56, %c0_57, %c0_58] : memref<1x8x32x64xf32, #tpu.memory_space<vmem>>, vector<1x1x32x64xf32>
    %73 = vector.shape_cast %72 : vector<1x1x32x64xf32> to vector<32x64xf32>
    %74 = vector.shape_cast %71 : vector<32x64xf32> to vector<1x1x32x64xf32>
    tpu.vector_store %arg7[%c0_55, %c0_56, %c0_57, %c0_58], %74 {strides = array<i32>} : memref<1x8x32x64xf32, #tpu.memory_space<vmem>>, vector<1x1x32x64xf32>,
    %c0_59 = arith.constant 0 : index
    %c0_60 = arith.constant 0 : index
    %75 = vector.load %arg5[%c0_59, %c0_60] : memref<96x32xbf16, #tpu.memory_space<vmem>>, vector<96x32xbf16>
    %76 = vector.extract_strided_slice %22 {offsets = [2, 0, 0], sizes = [1, 32, 64], strides = [1, 1, 1]} : vector<8x32x64xbf16> to vector<1x32x64xbf16>
    %77 = vector.shape_cast %76 : vector<1x32x64xbf16> to vector<32x64xbf16>
    %cst_61 = arith.constant dense<0.000000e+00> : vector<96x64xf32>
    %78 = tpu.matmul %75, %77, %cst_61 {dimension_numbers = #tpu.dot_dimension_numbers<[1], [0], [0], [1], [0, 0, 1, 1], [], []>} : vector<96x32xbf16>, vector<32x64xbf16>, vector<96x64xf32> -> vector<96x64xf32>
    %c0_62 = arith.constant 0 : index
    %c2_63 = arith.constant 2 : index
    %c0_64 = arith.constant 0 : index
    %c0_65 = arith.constant 0 : index
    %79 = vector.load %arg7[%c0_62, %c2_63, %c0_64, %c0_65] : memref<1x8x32x64xf32, #tpu.memory_space<vmem>>, vector<1x1x32x64xf32>
    %80 = vector.shape_cast %79 : vector<1x1x32x64xf32> to vector<32x64xf32>
    %81 = vector.extract_strided_slice %78 {offsets = [32, 0], sizes = [32, 64], strides = [1, 1]} : vector<96x64xf32> to vector<32x64xf32>
    %82 = arith.addf %80, %81 : vector<32x64xf32>
    %c0_66 = arith.constant 0 : index
    %c2_67 = arith.constant 2 : index
    %c0_68 = arith.constant 0 : index
    %c0_69 = arith.constant 0 : index
    %83 = vector.load %arg7[%c0_66, %c2_67, %c0_68, %c0_69] : memref<1x8x32x64xf32, #tpu.memory_space<vmem>>, vector<1x1x32x64xf32>
    %84 = vector.shape_cast %83 : vector<1x1x32x64xf32> to vector<32x64xf32>
    %85 = vector.shape_cast %82 : vector<32x64xf32> to vector<1x1x32x64xf32>
    tpu.vector_store %arg7[%c0_66, %c2_67, %c0_68, %c0_69], %85 {strides = array<i32>} : memref<1x8x32x64xf32, #tpu.memory_space<vmem>>, vector<1x1x32x64xf32>,
    %c0_70 = arith.constant 0 : index
    %c3 = arith.constant 3 : index
    %c0_71 = arith.constant 0 : index
    %c0_72 = arith.constant 0 : index
    %86 = vector.load %arg7[%c0_70, %c3, %c0_71, %c0_72] : memref<1x8x32x64xf32, #tpu.memory_space<vmem>>, vector<1x1x32x64xf32>
    %87 = vector.shape_cast %86 : vector<1x1x32x64xf32> to vector<32x64xf32>
    %88 = vector.extract_strided_slice %78 {offsets = [0, 0], sizes = [32, 64], strides = [1, 1]} : vector<96x64xf32> to vector<32x64xf32>
    %89 = arith.addf %87, %88 : vector<32x64xf32>
    %c0_73 = arith.constant 0 : index
    %c3_74 = arith.constant 3 : index
    %c0_75 = arith.constant 0 : index
    %c0_76 = arith.constant 0 : index
    %90 = vector.load %arg7[%c0_73, %c3_74, %c0_75, %c0_76] : memref<1x8x32x64xf32, #tpu.memory_space<vmem>>, vector<1x1x32x64xf32>
    %91 = vector.shape_cast %90 : vector<1x1x32x64xf32> to vector<32x64xf32>
    %92 = vector.shape_cast %89 : vector<32x64xf32> to vector<1x1x32x64xf32>
    tpu.vector_store %arg7[%c0_73, %c3_74, %c0_75, %c0_76], %92 {strides = array<i32>} : memref<1x8x32x64xf32, #tpu.memory_space<vmem>>, vector<1x1x32x64xf32>,
    %c0_77 = arith.constant 0 : index
    %c1_78 = arith.constant 1 : index
    %c0_79 = arith.constant 0 : index
    %c0_80 = arith.constant 0 : index
    %93 = vector.load %arg7[%c0_77, %c1_78, %c0_79, %c0_80] : memref<1x8x32x64xf32, #tpu.memory_space<vmem>>, vector<1x1x32x64xf32>
    %94 = vector.shape_cast %93 : vector<1x1x32x64xf32> to vector<32x64xf32>
    %95 = vector.extract_strided_slice %78 {offsets = [64, 0], sizes = [32, 64], strides = [1, 1]} : vector<96x64xf32> to vector<32x64xf32>
    %96 = arith.addf %94, %95 : vector<32x64xf32>
    %c0_81 = arith.constant 0 : index
    %c1_82 = arith.constant 1 : index
    %c0_83 = arith.constant 0 : index
    %c0_84 = arith.constant 0 : index
    %97 = vector.load %arg7[%c0_81, %c1_82, %c0_83, %c0_84] : memref<1x8x32x64xf32, #tpu.memory_space<vmem>>, vector<1x1x32x64xf32>
    %98 = vector.shape_cast %97 : vector<1x1x32x64xf32> to vector<32x64xf32>
    %99 = vector.shape_cast %96 : vector<32x64xf32> to vector<1x1x32x64xf32>
    tpu.vector_store %arg7[%c0_81, %c1_82, %c0_83, %c0_84], %99 {strides = array<i32>} : memref<1x8x32x64xf32, #tpu.memory_space<vmem>>, vector<1x1x32x64xf32>,
    %c0_85 = arith.constant 0 : index
    %c0_86 = arith.constant 0 : index
    %100 = vector.load %arg5[%c0_85, %c0_86] : memref<96x32xbf16, #tpu.memory_space<vmem>>, vector<96x32xbf16>
    %101 = vector.extract_strided_slice %22 {offsets = [3, 0, 0], sizes = [1, 32, 64], strides = [1, 1, 1]} : vector<8x32x64xbf16> to vector<1x32x64xbf16>
    %102 = vector.shape_cast %101 : vector<1x32x64xbf16> to vector<32x64xbf16>
    %cst_87 = arith.constant dense<0.000000e+00> : vector<96x64xf32>
    %103 = tpu.matmul %100, %102, %cst_87 {dimension_numbers = #tpu.dot_dimension_numbers<[1], [0], [0], [1], [0, 0, 1, 1], [], []>} : vector<96x32xbf16>, vector<32x64xbf16>, vector<96x64xf32> -> vector<96x64xf32>
    %c0_88 = arith.constant 0 : index
    %c3_89 = arith.constant 3 : index
    %c0_90 = arith.constant 0 : index
    %c0_91 = arith.constant 0 : index
    %104 = vector.load %arg7[%c0_88, %c3_89, %c0_90, %c0_91] : memref<1x8x32x64xf32, #tpu.memory_space<vmem>>, vector<1x1x32x64xf32>
    %105 = vector.shape_cast %104 : vector<1x1x32x64xf32> to vector<32x64xf32>
    %106 = vector.extract_strided_slice %103 {offsets = [32, 0], sizes = [32, 64], strides = [1, 1]} : vector<96x64xf32> to vector<32x64xf32>
    %107 = arith.addf %105, %106 : vector<32x64xf32>
    %c0_92 = arith.constant 0 : index
    %c3_93 = arith.constant 3 : index
    %c0_94 = arith.constant 0 : index
    %c0_95 = arith.constant 0 : index
    %108 = vector.load %arg7[%c0_92, %c3_93, %c0_94, %c0_95] : memref<1x8x32x64xf32, #tpu.memory_space<vmem>>, vector<1x1x32x64xf32>
    %109 = vector.shape_cast %108 : vector<1x1x32x64xf32> to vector<32x64xf32>
    %110 = vector.shape_cast %107 : vector<32x64xf32> to vector<1x1x32x64xf32>
    tpu.vector_store %arg7[%c0_92, %c3_93, %c0_94, %c0_95], %110 {strides = array<i32>} : memref<1x8x32x64xf32, #tpu.memory_space<vmem>>, vector<1x1x32x64xf32>,
    %c0_96 = arith.constant 0 : index
    %c4 = arith.constant 4 : index
    %c0_97 = arith.constant 0 : index
    %c0_98 = arith.constant 0 : index
    %111 = vector.load %arg7[%c0_96, %c4, %c0_97, %c0_98] : memref<1x8x32x64xf32, #tpu.memory_space<vmem>>, vector<1x1x32x64xf32>
    %112 = vector.shape_cast %111 : vector<1x1x32x64xf32> to vector<32x64xf32>
    %113 = vector.extract_strided_slice %103 {offsets = [0, 0], sizes = [32, 64], strides = [1, 1]} : vector<96x64xf32> to vector<32x64xf32>
    %114 = arith.addf %112, %113 : vector<32x64xf32>
    %c0_99 = arith.constant 0 : index
    %c4_100 = arith.constant 4 : index
    %c0_101 = arith.constant 0 : index
    %c0_102 = arith.constant 0 : index
    %115 = vector.load %arg7[%c0_99, %c4_100, %c0_101, %c0_102] : memref<1x8x32x64xf32, #tpu.memory_space<vmem>>, vector<1x1x32x64xf32>
    %116 = vector.shape_cast %115 : vector<1x1x32x64xf32> to vector<32x64xf32>
    %117 = vector.shape_cast %114 : vector<32x64xf32> to vector<1x1x32x64xf32>
    tpu.vector_store %arg7[%c0_99, %c4_100, %c0_101, %c0_102], %117 {strides = array<i32>} : memref<1x8x32x64xf32, #tpu.memory_space<vmem>>, vector<1x1x32x64xf32>,
    %c0_103 = arith.constant 0 : index
    %c2_104 = arith.constant 2 : index
    %c0_105 = arith.constant 0 : index
    %c0_106 = arith.constant 0 : index
    %118 = vector.load %arg7[%c0_103, %c2_104, %c0_105, %c0_106] : memref<1x8x32x64xf32, #tpu.memory_space<vmem>>, vector<1x1x32x64xf32>
    %119 = vector.shape_cast %118 : vector<1x1x32x64xf32> to vector<32x64xf32>
    %120 = vector.extract_strided_slice %103 {offsets = [64, 0], sizes = [32, 64], strides = [1, 1]} : vector<96x64xf32> to vector<32x64xf32>
    %121 = arith.addf %119, %120 : vector<32x64xf32>
    %c0_107 = arith.constant 0 : index
    %c2_108 = arith.constant 2 : index
    %c0_109 = arith.constant 0 : index
    %c0_110 = arith.constant 0 : index
    %122 = vector.load %arg7[%c0_107, %c2_108, %c0_109, %c0_110] : memref<1x8x32x64xf32, #tpu.memory_space<vmem>>, vector<1x1x32x64xf32>
    %123 = vector.shape_cast %122 : vector<1x1x32x64xf32> to vector<32x64xf32>
    %124 = vector.shape_cast %121 : vector<32x64xf32> to vector<1x1x32x64xf32>
    tpu.vector_store %arg7[%c0_107, %c2_108, %c0_109, %c0_110], %124 {strides = array<i32>} : memref<1x8x32x64xf32, #tpu.memory_space<vmem>>, vector<1x1x32x64xf32>,
    %c0_111 = arith.constant 0 : index
    %c0_112 = arith.constant 0 : index
    %125 = vector.load %arg5[%c0_111, %c0_112] : memref<96x32xbf16, #tpu.memory_space<vmem>>, vector<96x32xbf16>
    %126 = vector.extract_strided_slice %22 {offsets = [4, 0, 0], sizes = [1, 32, 64], strides = [1, 1, 1]} : vector<8x32x64xbf16> to vector<1x32x64xbf16>
    %127 = vector.shape_cast %126 : vector<1x32x64xbf16> to vector<32x64xbf16>
    %cst_113 = arith.constant dense<0.000000e+00> : vector<96x64xf32>
    %128 = tpu.matmul %125, %127, %cst_113 {dimension_numbers = #tpu.dot_dimension_numbers<[1], [0], [0], [1], [0, 0, 1, 1], [], []>} : vector<96x32xbf16>, vector<32x64xbf16>, vector<96x64xf32> -> vector<96x64xf32>
    %c0_114 = arith.constant 0 : index
    %c4_115 = arith.constant 4 : index
    %c0_116 = arith.constant 0 : index
    %c0_117 = arith.constant 0 : index
    %129 = vector.load %arg7[%c0_114, %c4_115, %c0_116, %c0_117] : memref<1x8x32x64xf32, #tpu.memory_space<vmem>>, vector<1x1x32x64xf32>
    %130 = vector.shape_cast %129 : vector<1x1x32x64xf32> to vector<32x64xf32>
    %131 = vector.extract_strided_slice %128 {offsets = [32, 0], sizes = [32, 64], strides = [1, 1]} : vector<96x64xf32> to vector<32x64xf32>
    %132 = arith.addf %130, %131 : vector<32x64xf32>
    %c0_118 = arith.constant 0 : index
    %c4_119 = arith.constant 4 : index
    %c0_120 = arith.constant 0 : index
    %c0_121 = arith.constant 0 : index
    %133 = vector.load %arg7[%c0_118, %c4_119, %c0_120, %c0_121] : memref<1x8x32x64xf32, #tpu.memory_space<vmem>>, vector<1x1x32x64xf32>
    %134 = vector.shape_cast %133 : vector<1x1x32x64xf32> to vector<32x64xf32>
    %135 = vector.shape_cast %132 : vector<32x64xf32> to vector<1x1x32x64xf32>
    tpu.vector_store %arg7[%c0_118, %c4_119, %c0_120, %c0_121], %135 {strides = array<i32>} : memref<1x8x32x64xf32, #tpu.memory_space<vmem>>, vector<1x1x32x64xf32>,
    %c0_122 = arith.constant 0 : index
    %c5 = arith.constant 5 : index
    %c0_123 = arith.constant 0 : index
    %c0_124 = arith.constant 0 : index
    %136 = vector.load %arg7[%c0_122, %c5, %c0_123, %c0_124] : memref<1x8x32x64xf32, #tpu.memory_space<vmem>>, vector<1x1x32x64xf32>
    %137 = vector.shape_cast %136 : vector<1x1x32x64xf32> to vector<32x64xf32>
    %138 = vector.extract_strided_slice %128 {offsets = [0, 0], sizes = [32, 64], strides = [1, 1]} : vector<96x64xf32> to vector<32x64xf32>
    %139 = arith.addf %137, %138 : vector<32x64xf32>
    %c0_125 = arith.constant 0 : index
    %c5_126 = arith.constant 5 : index
    %c0_127 = arith.constant 0 : index
    %c0_128 = arith.constant 0 : index
    %140 = vector.load %arg7[%c0_125, %c5_126, %c0_127, %c0_128] : memref<1x8x32x64xf32, #tpu.memory_space<vmem>>, vector<1x1x32x64xf32>
    %141 = vector.shape_cast %140 : vector<1x1x32x64xf32> to vector<32x64xf32>
    %142 = vector.shape_cast %139 : vector<32x64xf32> to vector<1x1x32x64xf32>
    tpu.vector_store %arg7[%c0_125, %c5_126, %c0_127, %c0_128], %142 {strides = array<i32>} : memref<1x8x32x64xf32, #tpu.memory_space<vmem>>, vector<1x1x32x64xf32>,
    %c0_129 = arith.constant 0 : index
    %c3_130 = arith.constant 3 : index
    %c0_131 = arith.constant 0 : index
    %c0_132 = arith.constant 0 : index
    %143 = vector.load %arg7[%c0_129, %c3_130, %c0_131, %c0_132] : memref<1x8x32x64xf32, #tpu.memory_space<vmem>>, vector<1x1x32x64xf32>
    %144 = vector.shape_cast %143 : vector<1x1x32x64xf32> to vector<32x64xf32>
    %145 = vector.extract_strided_slice %128 {offsets = [64, 0], sizes = [32, 64], strides = [1, 1]} : vector<96x64xf32> to vector<32x64xf32>
    %146 = arith.addf %144, %145 : vector<32x64xf32>
    %c0_133 = arith.constant 0 : index
    %c3_134 = arith.constant 3 : index
    %c0_135 = arith.constant 0 : index
    %c0_136 = arith.constant 0 : index
    %147 = vector.load %arg7[%c0_133, %c3_134, %c0_135, %c0_136] : memref<1x8x32x64xf32, #tpu.memory_space<vmem>>, vector<1x1x32x64xf32>
    %148 = vector.shape_cast %147 : vector<1x1x32x64xf32> to vector<32x64xf32>
    %149 = vector.shape_cast %146 : vector<32x64xf32> to vector<1x1x32x64xf32>
    tpu.vector_store %arg7[%c0_133, %c3_134, %c0_135, %c0_136], %149 {strides = array<i32>} : memref<1x8x32x64xf32, #tpu.memory_space<vmem>>, vector<1x1x32x64xf32>,
    %c0_137 = arith.constant 0 : index
    %c0_138 = arith.constant 0 : index
    %150 = vector.load %arg5[%c0_137, %c0_138] : memref<96x32xbf16, #tpu.memory_space<vmem>>, vector<96x32xbf16>
    %151 = vector.extract_strided_slice %22 {offsets = [5, 0, 0], sizes = [1, 32, 64], strides = [1, 1, 1]} : vector<8x32x64xbf16> to vector<1x32x64xbf16>
    %152 = vector.shape_cast %151 : vector<1x32x64xbf16> to vector<32x64xbf16>
    %cst_139 = arith.constant dense<0.000000e+00> : vector<96x64xf32>
    %153 = tpu.matmul %150, %152, %cst_139 {dimension_numbers = #tpu.dot_dimension_numbers<[1], [0], [0], [1], [0, 0, 1, 1], [], []>} : vector<96x32xbf16>, vector<32x64xbf16>, vector<96x64xf32> -> vector<96x64xf32>
    %c0_140 = arith.constant 0 : index
    %c5_141 = arith.constant 5 : index
    %c0_142 = arith.constant 0 : index
    %c0_143 = arith.constant 0 : index
    %154 = vector.load %arg7[%c0_140, %c5_141, %c0_142, %c0_143] : memref<1x8x32x64xf32, #tpu.memory_space<vmem>>, vector<1x1x32x64xf32>
    %155 = vector.shape_cast %154 : vector<1x1x32x64xf32> to vector<32x64xf32>
    %156 = vector.extract_strided_slice %153 {offsets = [32, 0], sizes = [32, 64], strides = [1, 1]} : vector<96x64xf32> to vector<32x64xf32>
    %157 = arith.addf %155, %156 : vector<32x64xf32>
    %c0_144 = arith.constant 0 : index
    %c5_145 = arith.constant 5 : index
    %c0_146 = arith.constant 0 : index
    %c0_147 = arith.constant 0 : index
    %158 = vector.load %arg7[%c0_144, %c5_145, %c0_146, %c0_147] : memref<1x8x32x64xf32, #tpu.memory_space<vmem>>, vector<1x1x32x64xf32>
    %159 = vector.shape_cast %158 : vector<1x1x32x64xf32> to vector<32x64xf32>
    %160 = vector.shape_cast %157 : vector<32x64xf32> to vector<1x1x32x64xf32>
    tpu.vector_store %arg7[%c0_144, %c5_145, %c0_146, %c0_147], %160 {strides = array<i32>} : memref<1x8x32x64xf32, #tpu.memory_space<vmem>>, vector<1x1x32x64xf32>,
    %c0_148 = arith.constant 0 : index
    %c6 = arith.constant 6 : index
    %c0_149 = arith.constant 0 : index
    %c0_150 = arith.constant 0 : index
    %161 = vector.load %arg7[%c0_148, %c6, %c0_149, %c0_150] : memref<1x8x32x64xf32, #tpu.memory_space<vmem>>, vector<1x1x32x64xf32>
    %162 = vector.shape_cast %161 : vector<1x1x32x64xf32> to vector<32x64xf32>
    %163 = vector.extract_strided_slice %153 {offsets = [0, 0], sizes = [32, 64], strides = [1, 1]} : vector<96x64xf32> to vector<32x64xf32>
    %164 = arith.addf %162, %163 : vector<32x64xf32>
    %c0_151 = arith.constant 0 : index
    %c6_152 = arith.constant 6 : index
    %c0_153 = arith.constant 0 : index
    %c0_154 = arith.constant 0 : index
    %165 = vector.load %arg7[%c0_151, %c6_152, %c0_153, %c0_154] : memref<1x8x32x64xf32, #tpu.memory_space<vmem>>, vector<1x1x32x64xf32>
    %166 = vector.shape_cast %165 : vector<1x1x32x64xf32> to vector<32x64xf32>
    %167 = vector.shape_cast %164 : vector<32x64xf32> to vector<1x1x32x64xf32>
    tpu.vector_store %arg7[%c0_151, %c6_152, %c0_153, %c0_154], %167 {strides = array<i32>} : memref<1x8x32x64xf32, #tpu.memory_space<vmem>>, vector<1x1x32x64xf32>,
    %c0_155 = arith.constant 0 : index
    %c4_156 = arith.constant 4 : index
    %c0_157 = arith.constant 0 : index
    %c0_158 = arith.constant 0 : index
    %168 = vector.load %arg7[%c0_155, %c4_156, %c0_157, %c0_158] : memref<1x8x32x64xf32, #tpu.memory_space<vmem>>, vector<1x1x32x64xf32>
    %169 = vector.shape_cast %168 : vector<1x1x32x64xf32> to vector<32x64xf32>
    %170 = vector.extract_strided_slice %153 {offsets = [64, 0], sizes = [32, 64], strides = [1, 1]} : vector<96x64xf32> to vector<32x64xf32>
    %171 = arith.addf %169, %170 : vector<32x64xf32>
    %c0_159 = arith.constant 0 : index
    %c4_160 = arith.constant 4 : index
    %c0_161 = arith.constant 0 : index
    %c0_162 = arith.constant 0 : index
    %172 = vector.load %arg7[%c0_159, %c4_160, %c0_161, %c0_162] : memref<1x8x32x64xf32, #tpu.memory_space<vmem>>, vector<1x1x32x64xf32>
    %173 = vector.shape_cast %172 : vector<1x1x32x64xf32> to vector<32x64xf32>
    %174 = vector.shape_cast %171 : vector<32x64xf32> to vector<1x1x32x64xf32>
    tpu.vector_store %arg7[%c0_159, %c4_160, %c0_161, %c0_162], %174 {strides = array<i32>} : memref<1x8x32x64xf32, #tpu.memory_space<vmem>>, vector<1x1x32x64xf32>,
    %c0_163 = arith.constant 0 : index
    %c0_164 = arith.constant 0 : index
    %175 = vector.load %arg5[%c0_163, %c0_164] : memref<96x32xbf16, #tpu.memory_space<vmem>>, vector<96x32xbf16>
    %176 = vector.extract_strided_slice %22 {offsets = [6, 0, 0], sizes = [1, 32, 64], strides = [1, 1, 1]} : vector<8x32x64xbf16> to vector<1x32x64xbf16>
    %177 = vector.shape_cast %176 : vector<1x32x64xbf16> to vector<32x64xbf16>
    %cst_165 = arith.constant dense<0.000000e+00> : vector<96x64xf32>
    %178 = tpu.matmul %175, %177, %cst_165 {dimension_numbers = #tpu.dot_dimension_numbers<[1], [0], [0], [1], [0, 0, 1, 1], [], []>} : vector<96x32xbf16>, vector<32x64xbf16>, vector<96x64xf32> -> vector<96x64xf32>
    %c0_166 = arith.constant 0 : index
    %c6_167 = arith.constant 6 : index
    %c0_168 = arith.constant 0 : index
    %c0_169 = arith.constant 0 : index
    %179 = vector.load %arg7[%c0_166, %c6_167, %c0_168, %c0_169] : memref<1x8x32x64xf32, #tpu.memory_space<vmem>>, vector<1x1x32x64xf32>
    %180 = vector.shape_cast %179 : vector<1x1x32x64xf32> to vector<32x64xf32>
    %181 = vector.extract_strided_slice %178 {offsets = [32, 0], sizes = [32, 64], strides = [1, 1]} : vector<96x64xf32> to vector<32x64xf32>
    %182 = arith.addf %180, %181 : vector<32x64xf32>
    %c0_170 = arith.constant 0 : index
    %c6_171 = arith.constant 6 : index
    %c0_172 = arith.constant 0 : index
    %c0_173 = arith.constant 0 : index
    %183 = vector.load %arg7[%c0_170, %c6_171, %c0_172, %c0_173] : memref<1x8x32x64xf32, #tpu.memory_space<vmem>>, vector<1x1x32x64xf32>
    %184 = vector.shape_cast %183 : vector<1x1x32x64xf32> to vector<32x64xf32>
    %185 = vector.shape_cast %182 : vector<32x64xf32> to vector<1x1x32x64xf32>
    tpu.vector_store %arg7[%c0_170, %c6_171, %c0_172, %c0_173], %185 {strides = array<i32>} : memref<1x8x32x64xf32, #tpu.memory_space<vmem>>, vector<1x1x32x64xf32>,
    %c0_174 = arith.constant 0 : index
    %c7 = arith.constant 7 : index
    %c0_175 = arith.constant 0 : index
    %c0_176 = arith.constant 0 : index
    %186 = vector.load %arg7[%c0_174, %c7, %c0_175, %c0_176] : memref<1x8x32x64xf32, #tpu.memory_space<vmem>>, vector<1x1x32x64xf32>
    %187 = vector.shape_cast %186 : vector<1x1x32x64xf32> to vector<32x64xf32>
    %188 = vector.extract_strided_slice %178 {offsets = [0, 0], sizes = [32, 64], strides = [1, 1]} : vector<96x64xf32> to vector<32x64xf32>
    %189 = arith.addf %187, %188 : vector<32x64xf32>
    %c0_177 = arith.constant 0 : index
    %c7_178 = arith.constant 7 : index
    %c0_179 = arith.constant 0 : index
    %c0_180 = arith.constant 0 : index
    %190 = vector.load %arg7[%c0_177, %c7_178, %c0_179, %c0_180] : memref<1x8x32x64xf32, #tpu.memory_space<vmem>>, vector<1x1x32x64xf32>
    %191 = vector.shape_cast %190 : vector<1x1x32x64xf32> to vector<32x64xf32>
    %192 = vector.shape_cast %189 : vector<32x64xf32> to vector<1x1x32x64xf32>
    tpu.vector_store %arg7[%c0_177, %c7_178, %c0_179, %c0_180], %192 {strides = array<i32>} : memref<1x8x32x64xf32, #tpu.memory_space<vmem>>, vector<1x1x32x64xf32>,
    %c0_181 = arith.constant 0 : index
    %c5_182 = arith.constant 5 : index
    %c0_183 = arith.constant 0 : index
    %c0_184 = arith.constant 0 : index
    %193 = vector.load %arg7[%c0_181, %c5_182, %c0_183, %c0_184] : memref<1x8x32x64xf32, #tpu.memory_space<vmem>>, vector<1x1x32x64xf32>
    %194 = vector.shape_cast %193 : vector<1x1x32x64xf32> to vector<32x64xf32>
    %195 = vector.extract_strided_slice %178 {offsets = [64, 0], sizes = [32, 64], strides = [1, 1]} : vector<96x64xf32> to vector<32x64xf32>
    %196 = arith.addf %194, %195 : vector<32x64xf32>
    %c0_185 = arith.constant 0 : index
    %c5_186 = arith.constant 5 : index
    %c0_187 = arith.constant 0 : index
    %c0_188 = arith.constant 0 : index
    %197 = vector.load %arg7[%c0_185, %c5_186, %c0_187, %c0_188] : memref<1x8x32x64xf32, #tpu.memory_space<vmem>>, vector<1x1x32x64xf32>
    %198 = vector.shape_cast %197 : vector<1x1x32x64xf32> to vector<32x64xf32>
    %199 = vector.shape_cast %196 : vector<32x64xf32> to vector<1x1x32x64xf32>
    tpu.vector_store %arg7[%c0_185, %c5_186, %c0_187, %c0_188], %199 {strides = array<i32>} : memref<1x8x32x64xf32, #tpu.memory_space<vmem>>, vector<1x1x32x64xf32>,
    %c0_189 = arith.constant 0 : index
    %c0_190 = arith.constant 0 : index
    %200 = vector.load %arg5[%c0_189, %c0_190] : memref<96x32xbf16, #tpu.memory_space<vmem>>, vector<96x32xbf16>
    %201 = vector.extract_strided_slice %22 {offsets = [7, 0, 0], sizes = [1, 32, 64], strides = [1, 1, 1]} : vector<8x32x64xbf16> to vector<1x32x64xbf16>
    %202 = vector.shape_cast %201 : vector<1x32x64xbf16> to vector<32x64xbf16>
    %cst_191 = arith.constant dense<0.000000e+00> : vector<96x64xf32>
    %203 = tpu.matmul %200, %202, %cst_191 {dimension_numbers = #tpu.dot_dimension_numbers<[1], [0], [0], [1], [0, 0, 1, 1], [], []>} : vector<96x32xbf16>, vector<32x64xbf16>, vector<96x64xf32> -> vector<96x64xf32>
    %c0_192 = arith.constant 0 : index
    %c7_193 = arith.constant 7 : index
    %c0_194 = arith.constant 0 : index
    %c0_195 = arith.constant 0 : index
    %204 = vector.load %arg7[%c0_192, %c7_193, %c0_194, %c0_195] : memref<1x8x32x64xf32, #tpu.memory_space<vmem>>, vector<1x1x32x64xf32>
    %205 = vector.shape_cast %204 : vector<1x1x32x64xf32> to vector<32x64xf32>
    %206 = vector.extract_strided_slice %203 {offsets = [32, 0], sizes = [32, 64], strides = [1, 1]} : vector<96x64xf32> to vector<32x64xf32>
    %207 = arith.addf %205, %206 : vector<32x64xf32>
    %c0_196 = arith.constant 0 : index
    %c7_197 = arith.constant 7 : index
    %c0_198 = arith.constant 0 : index
    %c0_199 = arith.constant 0 : index
    %208 = vector.load %arg7[%c0_196, %c7_197, %c0_198, %c0_199] : memref<1x8x32x64xf32, #tpu.memory_space<vmem>>, vector<1x1x32x64xf32>
    %209 = vector.shape_cast %208 : vector<1x1x32x64xf32> to vector<32x64xf32>
    %210 = vector.shape_cast %207 : vector<32x64xf32> to vector<1x1x32x64xf32>
    tpu.vector_store %arg7[%c0_196, %c7_197, %c0_198, %c0_199], %210 {strides = array<i32>} : memref<1x8x32x64xf32, #tpu.memory_space<vmem>>, vector<1x1x32x64xf32>,
    %c0_200 = arith.constant 0 : index
    %c6_201 = arith.constant 6 : index
    %c0_202 = arith.constant 0 : index
    %c0_203 = arith.constant 0 : index
    %211 = vector.load %arg7[%c0_200, %c6_201, %c0_202, %c0_203] : memref<1x8x32x64xf32, #tpu.memory_space<vmem>>, vector<1x1x32x64xf32>
    %212 = vector.shape_cast %211 : vector<1x1x32x64xf32> to vector<32x64xf32>
    %213 = vector.extract_strided_slice %203 {offsets = [64, 0], sizes = [32, 64], strides = [1, 1]} : vector<96x64xf32> to vector<32x64xf32>
    %214 = arith.addf %212, %213 : vector<32x64xf32>
    %c0_204 = arith.constant 0 : index
    %c6_205 = arith.constant 6 : index
    %c0_206 = arith.constant 0 : index
    %c0_207 = arith.constant 0 : index
    %215 = vector.load %arg7[%c0_204, %c6_205, %c0_206, %c0_207] : memref<1x8x32x64xf32, #tpu.memory_space<vmem>>, vector<1x1x32x64xf32>
    %216 = vector.shape_cast %215 : vector<1x1x32x64xf32> to vector<32x64xf32>
    %217 = vector.shape_cast %214 : vector<32x64xf32> to vector<1x1x32x64xf32>
    tpu.vector_store %arg7[%c0_204, %c6_205, %c0_206, %c0_207], %217 {strides = array<i32>} : memref<1x8x32x64xf32, #tpu.memory_space<vmem>>, vector<1x1x32x64xf32>,
    return
  }
  func.func @transform_0(%arg0: i32, %arg1: i32) -> (i32, i32, i32, i32) {
    %c0_i32 = arith.constant 0 : i32
    %c0_i32_0 = arith.constant 0 : i32
    %c0_i32_1 = arith.constant 0 : i32
    return %arg0, %c0_i32, %c0_i32_0, %arg1 : i32, i32, i32, i32
  }
  func.func @transform_1(%arg0: i32, %arg1: i32) -> (i32, i32, i32) {
    %c0_i32 = arith.constant 0 : i32
    %c0_i32_0 = arith.constant 0 : i32
    %c0_i32_1 = arith.constant 0 : i32
    return %arg0, %c0_i32, %c0_i32_0 : i32, i32, i32
  }
  func.func @transform_2(%arg0: i32, %arg1: i32) -> (i32, i32, i32) {
    %c0_i32 = arith.constant 0 : i32
    %c0_i32_0 = arith.constant 0 : i32
    %c0_i32_1 = arith.constant 0 : i32
    return %arg0, %c0_i32, %c0_i32_0 : i32, i32, i32
  }
  func.func @transform_3(%arg0: i32, %arg1: i32) -> (i32, i32) {
    %c0_i32 = arith.constant 0 : i32
    %c0_i32_0 = arith.constant 0 : i32
    %c0_i32_1 = arith.constant 0 : i32
    return %c0_i32, %c0_i32_0 : i32, i32
  }
  func.func @transform_4(%arg0: i32, %arg1: i32) -> (i32, i32) {
    %c0_i32 = arith.constant 0 : i32
    %c0_i32_0 = arith.constant 0 : i32
    %c0_i32_1 = arith.constant 0 : i32
    return %c0_i32, %c0_i32_0 : i32, i32
  }
  func.func @transform_5(%arg0: i32, %arg1: i32) -> (i32, i32, i32, i32) {
    %c0_i32 = arith.constant 0 : i32
    %c0_i32_0 = arith.constant 0 : i32
    %c0_i32_1 = arith.constant 0 : i32
    return %arg0, %c0_i32, %c0_i32_0, %arg1 : i32, i32, i32, i32
  }
}

</mosaic_0001>

<bundles_post_ra>
// kernel: tiny_temporal_conv_layer.1
= control target key start
LH: loop header
LB: loop body
LE: loop exit
PB: predicated region body
PF: predicated region fallthrough
CT: control target
= control target key end

     0   :  { %s3026_s18 = smov 0   ;;  %s3028_s19 = smov 0   ;;  %s3965_s0 = inlined_call_operand.vmem [shape: f32[2,8,32,64], index: 0, kind: input, shape index: {}]   ;;  %s3966_s1 = inlined_call_operand.vmem [shape: f32[2,32,1], index: 1, kind: input, shape index: {}]   ;;  %s3967_s2 = inlined_call_operand.vmem [shape: f32[2,32,1], index: 2, kind: input, shape index: {}]   ;;  %s3968_s3 = inlined_call_operand.vmem [shape: bf16[96,32], index: 3, kind: input, shape index: {}]   ;;  %s3969_s4 = inlined_call_operand.vmem [shape: f32[32,1], index: 4, kind: input, shape index: {}]   ;;  %s3970_s5 = inlined_call_operand.vmem [shape: f32[2,8,32,64], index: 5, kind: output, shape index: {}]  }
   0x1   :  { %s3030_s20 = smov 0  }
   0x2 LB: > { %s27_s21 = sadd.s32 1, %s2989_s19  ;;  %p2273_p0 = scmp.ge.s32.totalorder %s2993_s20, 1  ;;  %s2993_s20 = sphi %s3030_s20, %s15_s20   ;;  %s2989_s19 = sphi %s3028_s19, %s3972_s19   ;;  %s2985_s18 = sphi %s3026_s18, %s3971_s18  }
   0x3   : > { %p29_p1 = scmp.ge.s32.totalorder %s27_s21, 2  ;;  %p226_p2 = scmp.lt.s32.totalorder %s2993_s20, 3 }
   0x5   : > { %s3974_s21 = smov (%p29_p1, %s27_s21), 0  ;;  %p227_p3 = pnand %p2273_p0, %p226_p2 }
   0x6   : > { %p270_p4 = scmp.lt.s32.totalorder (!%p227_p3), %s2985_s18, 1  ;;  %v2995_v0 = vmov (!%p227_p3), 0   ;;  %v682_v9 = vld [vmem:[%s3969_s4 + $0x8] sm:$0xff] (!%p227_p3)  ;;  %v681_v10 = vld [vmem:[%s3969_s4] sm:$0xff] (!%p227_p3)  ;;  %v684_v11 = vld [vmem:[%s3969_s4 + $0x18] sm:$0xff] (!%p227_p3)  ;;  %vm812_vm0 = vcmask (!%p227_p3), 261120  }
   0x7   : > { %230 = sbr.rel (%p227_p3) target bundleno = 503 (0x1f7), region = 40  ;;  %2794 = vset.pattern.permute.xlu1 (!%p227_p3), %v2995_v0  ;;  %2793 = vset.pattern.permute.xlu0 (!%p227_p3), %v2995_v0  ;;  %v683_v12 = vld [vmem:[%s3969_s4 + $0x10] sm:$0xff] (!%p227_p3)  ;;  %v2795_v13 = vld [vmem:[%s3968_s3] sm:$0xff] (!%p227_p3)   ;;  %vm737_vm1 = vcmask (!%p227_p3), 523264  }
   0x8   : > { %v2796_v14 = vld [vmem:[%s3968_s3] sm:$0xff] (!%p227_p3)   ;;  %2644 = vmatprep.mubr.msk.bf16.mxu0 (!%p227_p3), %vm812_vm0, %v2795_v13 }
   0x9   : > { %2660 = vmatprep.mubr.msk.bf16.mxu1 (!%p227_p3), %vm812_vm0, %v2796_v14 }
   0xe   : > { %s3976_s18 = smov (!%p270_p4, %s2985_s18), 1 }
   0xf   : > { %s2573_s22 = sshll.u32 %s3976_s18, 5  ;;  %s2572_s16 = sshll.u32 %s3976_s18, 8 }
  0x10   : > { %s287_s25 = scalar_lea.vmem %s3967_s2, %s2573_s22  ;;  %s282_s28 = scalar_lea.vmem %s3966_s1, %s2573_s22 }
  0x11   : > { %v333_v1 = vld [vmem:[%s287_s25] sm:$0xff]  ;;  %v334_v3 = vld [vmem:[%s287_s25 + $0x8] sm:$0xff]  ;;  %v332_v5 = vld [vmem:[%s282_s28 + $0x18] sm:$0xff]  ;;  %s3079_s23 = scalar_lea.vmem %s3965_s0, %s2572_s16  ;;  %s3250_s26 = scalar_lea.vmem %s3970_s5, %s2572_s16 }
  0x12   : > { %391 = vperm.xlu1 %2794, %v333_v1   ;;  %v329_v2 = vld [vmem:[%s282_s28] sm:$0xff]  ;;  %v330_v4 = vld [vmem:[%s282_s28 + $0x8] sm:$0xff]  ;;  %v331_v6 = vld [vmem:[%s282_s28 + $0x10] sm:$0xff] }
  0x13   : > { %339 = vperm.xlu0 %2793, %v329_v2   ;;  %v336_v7 = vld [vmem:[%s287_s25 + $0x18] sm:$0xff]  ;;  %v335_v8 = vld [vmem:[%s287_s25 + $0x10] sm:$0xff]  ;;  %v3082_v15 = vld [vmem:[%s3079_s23] sm:$0xff] }
  0x14   : > { %v3085_v16 = vld [vmem:[%s3079_s23 + $0x20] sm:$0xff]  ;;  %v3115_v28 = vld [vmem:[%s3079_s23 + $0x8] sm:$0xff]  ;;  %v3155_v45 = vld [vmem:[%s3079_s23 + $0x18] sm:$0xff] }
  0x15   : > { %v3088_v17 = vld [vmem:[%s3079_s23 + $0x40] sm:$0xff]  ;;  %v3118_v29 = vld [vmem:[%s3079_s23 + $0x28] sm:$0xff]  ;;  %v3158_v46 = vld [vmem:[%s3079_s23 + $0x38] sm:$0xff] }
  0x16   : > { %396 = vperm.xlu1 %2794, %v334_v3   ;;  %v3091_v18 = vld [vmem:[%s3079_s23 + $0x60] sm:$0xff]  ;;  %v3131_v34 = vld [vmem:[%s3079_s23 + $0x48] sm:$0xff]  ;;  %v3177_v54 = vld [vmem:[%s3079_s23 + $0x10] sm:$0xff] }
  0x17   : > { %344 = vperm.xlu0 %2793, %v330_v4   ;;  %v3096_v20 = vld [vmem:[%s3079_s23 + $0x80] sm:$0xff]  ;;  %v3137_v36 = vld [vmem:[%s3079_s23 + $0x68] sm:$0xff]  ;;  %v3185_v57 = vld [vmem:[%s3079_s23 + $0x30] sm:$0xff] }
  0x18   : > { %v3101_v22 = vld [vmem:[%s3079_s23 + $0xa0] sm:$0xff]  ;;  %v3192_v60 = vld [vmem:[%s3079_s23 + $0x50] sm:$0xff]  ;;  %v3195_v61 = vld [vmem:[%s3079_s23 + $0x58] sm:$0xff] }
  0x19   : > { %v3112_v27 = vld [vmem:[%s3079_s23 + $0xc0] sm:$0xff] }
  0x1a   : > { %354 = vperm.xlu1 %2794, %v332_v5  }
  0x1b   : > { %349 = vperm.xlu0 %2793, %v331_v6  }
  0x1e   : > { %406 = vperm.xlu1 %2794, %v336_v7  }
  0x1f   : > { %401 = vperm.xlu0 %2793, %v335_v8  }
  0x22   : > { %692 = vperm.xlu1 %2794, %v682_v9  }
  0x23   : > { %687 = vperm.xlu0 %2793, %v681_v10   ;;  %v3221_v10 = vld [vmem:[%s3079_s23 + $0x70] sm:$0xff] }
  0x26   : > { %702 = vperm.xlu1 %2794, %v684_v11  }
  0x27   : > { %697 = vperm.xlu0 %2793, %v683_v12  }
  0x91   : > { %v3093_v19 = vpop.permute.xlu1 %391 }
  0x92   : > { %v3098_v21 = vpop.permute.xlu0 %339 }
  0x93   : > { %v357_v23 = vmul.f32 %v3098_v21, %v3082_v15  ;;  %v361_v24 = vmul.f32 %v3098_v21, %v3085_v16  ;;  %v365_v25 = vmul.f32 %v3098_v21, %v3088_v17  ;;  %v369_v26 = vmul.f32 %v3098_v21, %v3091_v18 }
  0x94   : > { %v373_v30 = vmul.f32 %v3098_v21, %v3096_v20  ;;  %v377_v37 = vmul.f32 %v3098_v21, %v3101_v22  ;;  %v381_v40 = vmul.f32 %v3098_v21, %v3112_v27 }
  0x95   : > { %v3122_v31 = vpop.permute.xlu1 %396  ;;  %v3125_v32 = vadd.f32 %v3093_v19, %v357_v23  ;;  %v3128_v33 = vadd.f32 %v3093_v19, %v361_v24  ;;  %v3134_v35 = vadd.f32 %v3093_v19, %v365_v25  ;;  %v3144_v39 = vadd.f32 %v3093_v19, %v369_v26 }
  0x96   : > { %v3141_v38 = vpop.permute.xlu0 %344  ;;  %v3166_v50 = vadd.f32 %v3093_v19, %v373_v30  ;;  %v3180_v55 = vadd.f32 %v3093_v19, %v377_v37  ;;  %v3198_v62 = vadd.f32 %v3093_v19, %v381_v40 }
  0x97   : > { %v358_v41 = vmul.f32 %v3141_v38, %v3115_v28  ;;  %v2282_v42 = vmul.f32 -1.442695, %v3125_v32  ;;  %v362_v43 = vmul.f32 %v3141_v38, %v3118_v29  ;;  %v2286_v44 = vmul.f32 -1.442695, %v3128_v33 }
  0x98   : > { %v366_v47 = vmul.f32 %v3141_v38, %v3131_v34  ;;  %v2290_v48 = vmul.f32 -1.442695, %v3134_v35  ;;  %v370_v49 = vmul.f32 %v3141_v38, %v3137_v36  ;;  %v2294_v59 = vmul.f32 -1.442695, %v3144_v39 }
  0x99   : > { %v3168_v51 = vpop.permute.xlu1 %354  ;;  %v3171_v52 = vadd.f32 %v3122_v31, %v358_v41  ;;  %2843 = vpow2.f32 %v2282_v42  ;;  %v3174_v53 = vadd.f32 %v3122_v31, %v362_v43 }
  0x9a   : > { %v3182_v56 = vpop.permute.xlu0 %349  ;;  %2845 = vpow2.f32 %v2286_v44  ;;  %v3188_v58 = vadd.f32 %v3122_v31, %v366_v47  ;;  %v360_v1 = vmul.f32 %v3168_v51, %v3155_v45  ;;  %v364_v2 = vmul.f32 %v3168_v51, %v3158_v46 }
  0x9b   : > { %v2283_v63 = vmul.f32 -1.442695, %v3171_v52  ;;  %v2287_v0 = vmul.f32 -1.442695, %v3174_v53  ;;  %v359_v3 = vmul.f32 %v3182_v56, %v3177_v54  ;;  %2847 = vpow2.f32 %v2290_v48 }
  0x9c   : > { %v2291_v4 = vmul.f32 -1.442695, %v3188_v58  ;;  %v3210_v5 = vadd.f32 %v3122_v31, %v370_v49  ;;  %v363_v7 = vmul.f32 %v3182_v56, %v3185_v57  ;;  %v367_v8 = vmul.f32 %v3182_v56, %v3192_v60 }
  0x9d   : > { %v3212_v6 = vpop.permute.xlu1 %406  ;;  %2849 = vpow2.f32 %v2283_v63  ;;  %v368_v9 = vmul.f32 %v3168_v51, %v3195_v61  ;;  %v371_v37 = vmul.f32 %v3182_v56, %v3221_v10 }
  0x9e   : > { %v3223_v11 = vpop.permute.xlu0 %401  ;;  %2851 = vpow2.f32 %v2287_v0  ;;  %v3226_v12 = vadd.f32 %v3212_v6, %v360_v1  ;;  %v3229_v13 = vadd.f32 %v3212_v6, %v364_v2  ;;  %v2295_v14 = vmul.f32 -1.442695, %v3210_v5 }
  0x9f   : > { %v3233_v23 = vadd.f32 %v3223_v11, %v359_v3  ;;  %v3236_v24 = vadd.f32 %v3223_v11, %v363_v7  ;;  %2853 = vpow2.f32 %v2291_v4  ;;  %v3239_v25 = vadd.f32 %v3223_v11, %v367_v8 }
  0xa0   : > { %v2285_v26 = vmul.f32 -1.442695, %v3226_v12  ;;  %v2289_v30 = vmul.f32 -1.442695, %v3229_v13  ;;  %2855 = vpow2.f32 %v2294_v59  ;;  %v3284_v2 = vadd.f32 %v3212_v6, %v368_v9 }
  0xa1   : > { %v3252_v40 = vpop.permute.xlu1 %692  ;;  %v2284_v41 = vmul.f32 -1.442695, %v3233_v23  ;;  %v2288_v42 = vmul.f32 -1.442695, %v3236_v24  ;;  %2857 = vpow2.f32 %v2295_v14  ;;  %v2292_v43 = vmul.f32 -1.442695, %v3239_v25 }
  0xa2   : > { %v3257_v44 = vpop.permute.xlu0 %687  ;;  %v706_v47 = vadd.f32 %v3252_v40, %v3115_v28  ;;  %v710_v48 = vadd.f32 %v3252_v40, %v3118_v29  ;;  %2859 = vpow2.f32 %v2285_v26  ;;  %v714_v49 = vadd.f32 %v3252_v40, %v3131_v34  ;;  %v314_v14 = vld [vmem:[%s3079_s23 + $0x88] sm:$0xff] }
  0xa3   : > { %v2844_v59 = vpop.eup %2843  ;;  %v705_v63 = vadd.f32 %v3257_v44, %v3082_v15  ;;  %v709_v0 = vadd.f32 %v3257_v44, %v3085_v16  ;;  %2861 = vpow2.f32 %v2284_v41  ;;  %v713_v28 = vadd.f32 %v3257_v44, %v3088_v17 }
  0xa4   : > { %v2846_v1 = vpop.eup %2845  ;;  %v537_v29 = vadd.f32 1.0, %v2844_v59  ;;  %2863 = vpow2.f32 %v2288_v42  ;;  %v717_v34 = vadd.f32 %v3257_v44, %v3091_v18  ;;  %v718_v15 = vadd.f32 %v3252_v40, %v3137_v36  ;;  %739 = vst.msk [vmem:[%s3250_s26 + $0x8] sm:$0xff] %vm737_vm1, %v706_v47  ;;  %743 = vst.msk [vmem:[%s3250_s26 + $0x28] sm:$0xff] %vm737_vm1, %v710_v48  ;;  %v312_v18 = vld [vmem:[%s3079_s23 + $0x78] sm:$0xff] }
  0xa5   : > { %747 = vst.msk [vmem:[%s3250_s26 + $0x48] sm:$0xff] %vm737_vm1, %v714_v49  ;;  %v3281_v16 = vpop.permute.xlu1 %702  ;;  %v541_v17 = vadd.f32 1.0, %v2846_v1  ;;  %2865 = vpow2.f32 %v2289_v30  ;;  %v3288_v3 = vadd.f32 %v3223_v11, %v371_v37  ;;  %738 = vst.msk [vmem:[%s3250_s26] sm:$0xff] %vm737_vm1, %v705_v63  ;;  %v2848_v36 = vpop.eup %2847  ;;  %v372_v42 = vmul.f32 %v3168_v51, %v312_v18  ;;  %v318_v63 = vld [vmem:[%s3079_s23 + $0xa8] sm:$0xff] }
  0xa6   : > { %742 = vst.msk [vmem:[%s3250_s26 + $0x20] sm:$0xff] %vm737_vm1, %v709_v0  ;;  %746 = vst.msk [vmem:[%s3250_s26 + $0x40] sm:$0xff] %vm737_vm1, %v713_v28  ;;  %v3296_v4 = vpop.permute.xlu0 %697  ;;  %2867 = vrcp.f32 %v537_v29  ;;  %v708_v7 = vadd.f32 %v3281_v16, %v3155_v45  ;;  %v712_v8 = vadd.f32 %v3281_v16, %v3158_v46  ;;  %v716_v9 = vadd.f32 %v3281_v16, %v3195_v61 }
  0xa7   : > { %750 = vst.msk [vmem:[%s3250_s26 + $0x60] sm:$0xff] %vm737_vm1, %v717_v34  ;;  %751 = vst.msk [vmem:[%s3250_s26 + $0x68] sm:$0xff] %vm737_vm1, %v718_v15  ;;  %v2850_v26 = vpop.eup %2849  ;;  %2869 = vrcp.f32 %v541_v17  ;;  %v707_v30 = vadd.f32 %v3296_v4, %v3177_v54  ;;  %v711_v45 = vadd.f32 %v3296_v4, %v3185_v57  ;;  %v545_v46 = vadd.f32 1.0, %v2848_v36 }
  0xa8   : > { %v2852_v37 = vpop.eup %2851  ;;  %v538_v41 = vadd.f32 1.0, %v2850_v26  ;;  %2871 = vpow2.f32 %v2292_v43  ;;  %v715_v61 = vadd.f32 %v3296_v4, %v3192_v60  ;;  %741 = vst.msk [vmem:[%s3250_s26 + $0x18] sm:$0xff] %vm737_vm1, %v708_v7  ;;  %745 = vst.msk [vmem:[%s3250_s26 + $0x38] sm:$0xff] %vm737_vm1, %v712_v8  ;;  %v719_v47 = vadd.f32 %v3296_v4, %v3221_v10 }
  0xa9   : > { %749 = vst.msk [vmem:[%s3250_s26 + $0x58] sm:$0xff] %vm737_vm1, %v716_v9  ;;  %v2854_v54 = vpop.eup %2853  ;;  %v542_v57 = vadd.f32 1.0, %v2852_v37  ;;  %2873 = vrcp.f32 %v545_v46  ;;  %v374_v43 = vmul.f32 %v3141_v38, %v314_v14  ;;  %744 = vst.msk [vmem:[%s3250_s26 + $0x30] sm:$0xff] %vm737_vm1, %v711_v45  ;;  %v3330_v49 = vadd.f32 %v3212_v6, %v372_v42  ;;  %v315_v9 = vld [vmem:[%s3079_s23 + $0x90] sm:$0xff] }
  0xaa   : > { %740 = vst.msk [vmem:[%s3250_s26 + $0x10] sm:$0xff] %vm737_vm1, %v707_v30  ;;  %v2856_v60 = vpop.eup %2855  ;;  %2875 = vrcp.f32 %v538_v41  ;;  %v546_v48 = vadd.f32 1.0, %v2854_v54  ;;  %v720_v59 = vadd.f32 %v3281_v16, %v312_v18  ;;  %748 = vst.msk [vmem:[%s3250_s26 + $0x50] sm:$0xff] %vm737_vm1, %v715_v61  ;;  %v2293_v28 = vmul.f32 -1.442695, %v3284_v2  ;;  %v316_v61 = vld [vmem:[%s3079_s23 + $0x98] sm:$0xff] }
  0xab   : > { %v2858_v10 = vpop.eup %2857  ;;  %2877 = vrcp.f32 %v542_v57  ;;  %v549_v0 = vadd.f32 1.0, %v2856_v60  ;;  %v2296_v1 = vmul.f32 -1.442695, %v3288_v3  ;;  %752 = vst.msk [vmem:[%s3250_s26 + $0x70] sm:$0xff] %vm737_vm1, %v719_v47  ;;  %v721_v15 = vadd.f32 %v3257_v44, %v3096_v20  ;;  %v319_v47 = vld [vmem:[%s3079_s23 + $0xb0] sm:$0xff] }
  0xac   : > { %v2860_v29 = vpop.eup %2859  ;;  %2879 = vrcp.f32 %v546_v48  ;;  %v550_v34 = vadd.f32 1.0, %v2858_v10  ;;  %v722_v17 = vadd.f32 %v3252_v40, %v314_v14  ;;  %753 = vst.msk [vmem:[%s3250_s26 + $0x78] sm:$0xff] %vm737_vm1, %v720_v59  ;;  %v3346_v7 = vadd.f32 %v3122_v31, %v374_v43 }
  0xad   : > { %v2862_v18 = vpop.eup %2861  ;;  %v540_v36 = vadd.f32 1.0, %v2860_v29  ;;  %2881 = vrcp.f32 %v549_v0  ;;  %v378_v8 = vmul.f32 %v3141_v38, %v318_v63  ;;  %v2297_v20 = vmul.f32 -1.442695, %v3330_v49  ;;  %754 = vst.msk [vmem:[%s3250_s26 + $0x80] sm:$0xff] %vm737_vm1, %v721_v15 }
  0xae   : > { %v2864_v26 = vpop.eup %2863  ;;  %v539_v30 = vadd.f32 1.0, %v2862_v18  ;;  %2883 = vrcp.f32 %v550_v34  ;;  %v725_v14 = vadd.f32 %v3257_v44, %v3101_v22  ;;  %755 = vst.msk [vmem:[%s3250_s26 + $0x88] sm:$0xff] %vm737_vm1, %v722_v17  ;;  %v2298_v37 = vmul.f32 -1.442695, %v3166_v50  ;;  %v320_v34 = vld [vmem:[%s3079_s23 + $0xb8] sm:$0xff] }
  0xaf   : > { %v2866_v45 = vpop.eup %2865  ;;  %2885 = vrcp.f32 %v540_v36  ;;  %v543_v46 = vadd.f32 1.0, %v2864_v26  ;;  %v726_v41 = vadd.f32 %v3252_v40, %v318_v63  ;;  %v3361_v57 = vadd.f32 %v3122_v31, %v378_v8 }
  0xb0   : > { %v2868_v42 = vpop.eup %2867  ;;  %2887 = vrcp.f32 %v539_v30  ;;  %v544_v54 = vadd.f32 1.0, %v2866_v45  ;;  %v375_v22 = vmul.f32 %v3182_v56, %v315_v9  ;;  %758 = vst.msk [vmem:[%s3250_s26 + $0xa0] sm:$0xff] %vm737_vm1, %v725_v14  ;;  %v2299_v60 = vmul.f32 -1.442695, %v3346_v7 }
  0xb1   : > { %v2870_v43 = vpop.eup %2869  ;;  %2889 = vrcp.f32 %v543_v46  ;;  %v2302_v48 = vmul.f32 -1.442695, %v3180_v55  ;;  %v723_v59 = vadd.f32 %v3296_v4, %v315_v9  ;;  %759 = vst.msk [vmem:[%s3250_s26 + $0xa8] sm:$0xff] %vm737_vm1, %v726_v41  ;;  %v633_v10 = vmul.f32 %v2868_v42, %v3125_v32  ;;  %v3393_v46 = vld [vmem:[%s3079_s23 + $0xe0] sm:$0xff] }
  0xb2   : > { %v2872_v63 = vpop.eup %2871  ;;  %2891 = vrcp.f32 %v544_v54  ;;  %v376_v0 = vmul.f32 %v3168_v51, %v316_v61  ;;  %v3375_v29 = vadd.f32 %v3223_v11, %v375_v22  ;;  %v724_v18 = vadd.f32 %v3281_v16, %v316_v61 }
  0xb3   : > { %v2874_v15 = vpop.eup %2873  ;;  %2893 = vpow2.f32 %v2293_v28  ;;  %v547_v17 = vadd.f32 1.0, %v2872_v63  ;;  %v379_v36 = vmul.f32 %v3182_v56, %v319_v47  ;;  %756 = vst.msk [vmem:[%s3250_s26 + $0x90] sm:$0xff] %vm737_vm1, %v723_v59  ;;  %v637_v32 = vmul.f32 %v2870_v43, %v3128_v33  ;;  %v322_v43 = vld [vmem:[%s3079_s23 + $0xc8] sm:$0xff] }
  0xb4   : > { %v2876_v8 = vpop.eup %2875  ;;  %2895 = vpow2.f32 %v2296_v1  ;;  %v2303_v9 = vmul.f32 -1.442695, %v3361_v57  ;;  %v3385_v26 = vadd.f32 %v3212_v6, %v376_v0  ;;  %v380_v14 = vmul.f32 %v3168_v51, %v320_v34  ;;  %757 = vst.msk [vmem:[%s3250_s26 + $0x98] sm:$0xff] %vm737_vm1, %v724_v18 }
  0xb5   : > { %v2878_v30 = vpop.eup %2877  ;;  %v634_v28 = vmul.f32 %v2876_v8, %v3171_v52  ;;  %2897 = vrcp.f32 %v547_v17  ;;  %v3390_v45 = vadd.f32 %v3223_v11, %v379_v36  ;;  %v727_v41 = vadd.f32 %v3296_v4, %v319_v47 }
  0xb6   : > { %v2880_v33 = vpop.eup %2879  ;;  %v638_v1 = vmul.f32 %v2878_v30, %v3174_v53  ;;  %2899 = vpow2.f32 %v2297_v20  ;;  %v728_v52 = vadd.f32 %v3281_v16, %v320_v34  ;;  %v2300_v54 = vmul.f32 -1.442695, %v3375_v29 }
  0xb7   : > { %v2882_v61 = vpop.eup %2881  ;;  %v665_v42 = vpack.c.bf16 %v634_v28, %v633_v10  ;;  %2901 = vpow2.f32 %v2298_v37  ;;  %v3402_v22 = vadd.f32 %v3212_v6, %v380_v14  ;;  %v2301_v53 = vmul.f32 -1.442695, %v3385_v26  ;;  %760 = vst.msk [vmem:[%s3250_s26 + $0xb0] sm:$0xff] %vm737_vm1, %v727_v41 }
  0xb8   : > { %v2884_v59 = vpop.eup %2883  ;;  %v667_v63 = vpack.c.bf16 %v638_v1, %v637_v32  ;;  %2903 = vpow2.f32 %v2299_v60  ;;  %v385_v20 = vmul.f32 %v3098_v21, %v3393_v46  ;;  %761 = vst.msk [vmem:[%s3250_s26 + $0xb8] sm:$0xff] %vm737_vm1, %v728_v52  ;;  %v641_v37 = vmul.f32 %v2874_v15, %v3134_v35 }
  0xb9   : > { %v2886_v47 = vpop.eup %2885  ;;  %2640 = vmatprep.subr.bf16.mxu0 %v665_v42  ;;  %v642_v10 = vmul.f32 %v2880_v33, %v3188_v58  ;;  %2905 = vpow2.f32 %v2302_v48  ;;  %v2304_v0 = vmul.f32 -1.442695, %v3390_v45  ;;  %v2305_v21 = vmul.f32 -1.442695, %v3402_v22  ;;  %v326_v33 = vld [vmem:[%s3079_s23 + $0xe8] sm:$0xff] }
  0xba   : > { %v2888_v34 = vpop.eup %2887  ;;  %2656 = vmatprep.subr.bf16.mxu1 %v667_v63  ;;  %2641 = vmatpush3.bf16.msra.mxu0 %v665_v42  ;;  %v636_v60 = vmul.f32 %v2886_v47, %v3226_v12  ;;  %2907 = vpow2.f32 %v2303_v9  ;;  %v382_v17 = vmul.f32 %v3141_v38, %v322_v43  ;;  %v2306_v58 = vmul.f32 -1.442695, %v3198_v62 }
  0xbb   : > { %v2890_v18 = vpop.eup %2889  ;;  %2657 = vmatpush3.bf16.msra.mxu1 %v667_v63  ;;  %v635_v35 = vmul.f32 %v2888_v34, %v3233_v23  ;;  %2909 = vpow2.f32 %v2300_v54  ;;  %v729_v48 = vadd.f32 %v3257_v44, %v3112_v27  ;;  %v730_v8 = vadd.f32 %v3252_v40, %v322_v43 }
  0xbc   : > { %v2892_v15 = vpop.eup %2891  ;;  %v639_v12 = vmul.f32 %v2890_v18, %v3236_v24  ;;  %2911 = vpow2.f32 %v2301_v53  ;;  %v3424_v36 = vadd.f32 %v3122_v31, %v382_v17  ;;  %v646_v30 = vmul.f32 %v2884_v59, %v3210_v5  ;;  %v2797_v5 = vld [vmem:[%s3968_s3 + $0x8] sm:$0xff]  }
  0xbd   : > { %v2894_v32 = vpop.eup %2893  ;;  %v666_v9 = vpack.c.bf16 %v636_v60, %v635_v35  ;;  %v640_v23 = vmul.f32 %v2892_v15, %v3229_v13  ;;  %2913 = vpow2.f32 %v2304_v0  ;;  %762 = vst.msk [vmem:[%s3250_s26 + $0xc0] sm:$0xff] %vm737_vm1, %v729_v48  ;;  %v645_v28 = vmul.f32 %v2882_v61, %v3144_v39  ;;  %763 = vst.msk [vmem:[%s3250_s26 + $0xc8] sm:$0xff] %vm737_vm1, %v730_v8  ;;  %v2799_v39 = vld [vmem:[%s3968_s3 + $0x10] sm:$0xff]   ;;  %v2798_v53 = vld [vmem:[%s3968_s3 + $0x8] sm:$0xff]  }
  0xbe   : > { %v2896_v27 = vpop.eup %2895  ;;  %v548_v24 = vadd.f32 1.0, %v2894_v32  ;;  %2915 = vpow2.f32 %v2305_v21  ;;  %v2307_v14 = vmul.f32 -1.442695, %v3424_v36  ;;  %v669_v52 = vpack.c.bf16 %v642_v10, %v641_v37  ;;  %v327_v15 = vld [vmem:[%s3079_s23 + $0xf0] sm:$0xff] }
  0xbf   : > { %v2898_v1 = vpop.eup %2897  ;;  %2642 = vmatprep.subr.bf16.mxu0 %v666_v9  ;;  %v668_v41 = vpack.c.bf16 %v640_v23, %v639_v12  ;;  %v551_v13 = vadd.f32 1.0, %v2896_v27  ;;  %2917 = vpow2.f32 %v2306_v58  ;;  %v3443_v61 = vadd.f32 %v3093_v19, %v385_v20  ;;  %v323_v20 = vld [vmem:[%s3079_s23 + $0xd0] sm:$0xff]  ;;  %v328_v23 = vld [vmem:[%s3079_s23 + $0xf8] sm:$0xff] }
  0xc0   : > { %v2900_v42 = vpop.eup %2899  ;;  %2643 = vmatpush3.bf16.msra.mxu0 %v666_v9  ;;  %2919 = vrcp.f32 %v548_v24  ;;  %v733_v54 = vadd.f32 %v3257_v44, %v3393_v46  ;;  %v734_v43 = vadd.f32 %v3252_v40, %v326_v33  ;;  %v671_v63 = vpack.c.bf16 %v646_v30, %v645_v28  ;;  %v2800_v40 = vld [vmem:[%s3968_s3 + $0x10] sm:$0xff]   ;;  %v324_v46 = vld [vmem:[%s3079_s23 + $0xd8] sm:$0xff] }
  0xc1   : > { %v2902_v59 = vpop.eup %2901  ;;  %2658 = vmatprep.subr.bf16.mxu1 %v668_v41  ;;  %2672 = vmatprep.subr.bf16.mxu0 %v669_v52  ;;  %v552_v47 = vadd.f32 1.0, %v2900_v42  ;;  %2921 = vrcp.f32 %v551_v13  ;;  %v386_v19 = vmul.f32 %v3141_v38, %v326_v33  ;;  %v731_v10 = vadd.f32 %v3296_v4, %v323_v20 }
  0xc2   : > { %v2904_v37 = vpop.eup %2903  ;;  %2659 = vmatpush3.bf16.msra.mxu1 %v668_v41  ;;  %v553_v44 = vadd.f32 1.0, %v2902_v59  ;;  %2923 = vpow2.f32 %v2307_v14  ;;  %766 = vst.msk [vmem:[%s3250_s26 + $0xe0] sm:$0xff] %vm737_vm1, %v733_v54  ;;  %767 = vst.msk [vmem:[%s3250_s26 + $0xe8] sm:$0xff] %vm737_vm1, %v734_v43  ;;  %v732_v34 = vadd.f32 %v3281_v16, %v324_v46  ;;  %v2310_v17 = vmul.f32 -1.442695, %v3443_v61  ;;  %v2803_v14 = vld [vmem:[%s3968_s3 + $0x20] sm:$0xff]  }
  0xc3   : > { %v2906_v0 = vpop.eup %2905  ;;  %2688 = vmatprep.subr.bf16.mxu1 %v671_v63  ;;  %2645 = vmatmul.mubr.msk.bf16.vlgmr.msra.gmra.mrb[0].mxu0 %vm812_vm0, %v2797_v5  ;;  %2925 = vrcp.f32 %v552_v47  ;;  %v554_v38 = vadd.f32 1.0, %v2904_v37  ;;  %764 = vst.msk [vmem:[%s3250_s26 + $0xd0] sm:$0xff] %vm737_vm1, %v731_v10  ;;  %v3470_v58 = vadd.f32 %v3122_v31, %v386_v19  ;;  %v383_v48 = vmul.f32 %v3182_v56, %v323_v20  ;;  %v2801_v31 = vld [vmem:[%s3968_s3 + $0x18] sm:$0xff]  }
  0xc4   : > { %v2908_v60 = vpop.eup %2907  ;;  %2673 = vmatpush3.bf16.msra.mxu0 %v669_v52  ;;  %2927 = vrcp.f32 %v553_v44  ;;  %v557_v21 = vadd.f32 1.0, %v2906_v0  ;;  %2648 = vmatprep.mubr.msk.bf16.mxu0 %vm812_vm0, %v2799_v39  ;;  %765 = vst.msk [vmem:[%s3250_s26 + $0xd8] sm:$0xff] %vm737_vm1, %v732_v34  ;;  %v643_v8 = vmul.f32 %v2898_v1, %v3239_v25  ;;  %v384_v9 = vmul.f32 %v3168_v51, %v324_v46  ;;  %v2802_v5 = vld [vmem:[%s3968_s3 + $0x18] sm:$0xff]   ;;  %v2805_v46 = vld [vmem:[%s3968_s3 + $0x28] sm:$0xff]  }
  0xc5   : > { %v2910_v18 = vpop.eup %2909  ;;  %2661 = vmatmul.mubr.msk.bf16.vlgmr.msra.gmra.mrb[0].mxu1 %vm812_vm0, %v2798_v53  ;;  %2929 = vrcp.f32 %v554_v38  ;;  %v558_v35 = vadd.f32 1.0, %v2908_v60  ;;  %v3484_v28 = vadd.f32 %v3223_v11, %v383_v48  ;;  %v735_v25 = vadd.f32 %v3296_v4, %v327_v15  ;;  %v2807_v60 = vld [vmem:[%s3968_s3] sm:$0xff]  }
  0xc6   : > { %v2912_v12 = vpop.eup %2911  ;;  %2689 = vmatpush3.bf16.msra.mxu1 %v671_v63  ;;  %2931 = vrcp.f32 %v557_v21  ;;  %2664 = vmatprep.mubr.msk.bf16.mxu1 %vm812_vm0, %v2800_v40  ;;  %v555_v32 = vadd.f32 1.0, %v2910_v18  ;;  %v387_v1 = vmul.f32 %v3182_v56, %v327_v15  ;;  %v736_v41 = vadd.f32 %v3281_v16, %v328_v23  ;;  %v2804_v56 = vld [vmem:[%s3968_s3 + $0x20] sm:$0xff]  }
  0xc7   : > { %v2914_v30 = vpop.eup %2913  ;;  %2933 = vrcp.f32 %v558_v35  ;;  %v556_v27 = vadd.f32 1.0, %v2912_v12  ;;  %v3496_v4 = vadd.f32 %v3212_v6, %v384_v9  ;;  %v388_v42 = vmul.f32 %v3168_v51, %v328_v23  ;;  %768 = vst.msk [vmem:[%s3250_s26 + $0xf0] sm:$0xff] %vm737_vm1, %v735_v25  ;;  %v2809_v9 = vld [vmem:[%s3968_s3 + $0x8] sm:$0xff]   ;;  %v2811_v25 = vld [vmem:[%s3968_s3 + $0x10] sm:$0xff]  }
  0xc8   : > { %v2916_v24 = vpop.eup %2915  ;;  %2935 = vrcp.f32 %v555_v32  ;;  %v559_v33 = vadd.f32 1.0, %v2914_v30  ;;  %v2311_v54 = vmul.f32 -1.442695, %v3470_v58  ;;  %v3506_v43 = vadd.f32 %v3223_v11, %v387_v1  ;;  %769 = vst.msk [vmem:[%s3250_s26 + $0xf8] sm:$0xff] %vm737_vm1, %v736_v41 }
  0xc9   : > { %v2918_v52 = vpop.eup %2917  ;;  %2937 = vrcp.f32 %v556_v27  ;;  %v560_v13 = vadd.f32 1.0, %v2916_v24  ;;  %v3513_v51 = vadd.f32 %v3212_v6, %v388_v42  ;;  %v2308_v11 = vmul.f32 -1.442695, %v3484_v28 }
  0xca   : > { %v2920_v39 = vpop.eup %2919  ;;  %2939 = vrcp.f32 %v559_v33  ;;  %v561_v16 = vadd.f32 1.0, %v2918_v52 }
  0xcb   : > { %v2922_v59 = vpop.eup %2921  ;;  %v644_v63 = vmul.f32 %v2920_v39, %v3284_v2  ;;  %2649 = vmatmul.mubr.msk.bf16.gmra.mrb[4].mxu0 %vm812_vm0, %v2801_v31  ;;  %2941 = vrcp.f32 %v560_v13  ;;  %v2309_v2 = vmul.f32 -1.442695, %v3496_v4  ;;  %v2313_v10 = vmul.f32 -1.442695, %v3513_v51 }
  0xcc   : > { %v2924_v53 = vpop.eup %2923  ;;  %v647_v47 = vmul.f32 %v2922_v59, %v3288_v3  ;;  %2652 = vmatprep.mubr.msk.bf16.mxu0 %vm812_vm0, %v2803_v14  ;;  %2943 = vrcp.f32 %v561_v16  ;;  %v2312_v3 = vmul.f32 -1.442695, %v3506_v43  ;;  %v2810_v14 = vld [vmem:[%s3968_s3 + $0x8] sm:$0xff]  }
  0xcd   : > { %v2926_v19 = vpop.eup %2925  ;;  %v670_v20 = vpack.c.bf16 %v644_v63, %v643_v8  ;;  %2665 = vmatmul.mubr.msk.bf16.gmra.mrb[4].mxu1 %vm812_vm0, %v2802_v5  ;;  %v562_v37 = vadd.f32 1.0, %v2924_v53  ;;  %2945 = vpow2.f32 %v2310_v17  ;;  %v2806_v17 = vld [vmem:[%s3968_s3 + $0x28] sm:$0xff]   ;;  %v2815_v63 = vld [vmem:[%s3968_s3 + $0x20] sm:$0xff]  }
  0xce   : > { %v2928_v44 = vpop.eup %2927  ;;  %v648_v6 = vmul.f32 %v2926_v19, %v3330_v49  ;;  %2668 = vmatprep.mubr.msk.bf16.mxu1 %vm812_vm0, %v2804_v56  ;;  %2947 = vpow2.f32 %v2311_v54 }
  0xcf   : > { %v2930_v40 = vpop.eup %2929  ;;  %2674 = vmatprep.subr.bf16.mxu0 %v670_v20  ;;  %2949 = vrcp.f32 %v562_v37  ;;  %v649_v34 = vmul.f32 %v2928_v44, %v3166_v50 }
  0xd0   : > { %v2932_v0 = vpop.eup %2931  ;;  %v672_v38 = vpack.c.bf16 %v648_v6, %v647_v47  ;;  %2675 = vmatpush3.bf16.msra.mxu0 %v670_v20  ;;  %v650_v49 = vmul.f32 %v2930_v40, %v3346_v7  ;;  %2951 = vpow2.f32 %v2308_v11  ;;  %v2808_v7 = vld [vmem:[%s3968_s3] sm:$0xff]  }
  0xd1   : > { %v2934_v21 = vpop.eup %2933  ;;  %2953 = vpow2.f32 %v2309_v2  ;;  %v653_v48 = vmul.f32 %v2932_v0, %v3180_v55  ;;  %v2816_v47 = vld [vmem:[%s3968_s3 + $0x20] sm:$0xff]   ;;  %v2817_v2 = vld [vmem:[%s3968_s3 + $0x28] sm:$0xff]  }
  0xd2   : > { %v2936_v18 = vpop.eup %2935  ;;  %2690 = vmatprep.subr.bf16.mxu1 %v672_v38  ;;  %v673_v35 = vpack.c.bf16 %v650_v49, %v649_v34  ;;  %v654_v50 = vmul.f32 %v2934_v21, %v3361_v57  ;;  %2955 = vpow2.f32 %v2312_v3  ;;  %v2819_v6 = vld [vmem:[%s3968_s3] sm:$0xff]   ;;  %v2818_v3 = vld [vmem:[%s3968_s3 + $0x28] sm:$0xff]   ;;  %v2823_v49 = vld [vmem:[%s3968_s3 + $0x10] sm:$0xff]  }
  0xd3   : > { %v2938_v15 = vpop.eup %2937  ;;  %2691 = vmatpush3.bf16.msra.mxu1 %v672_v38  ;;  %2653 = vmatmul.mubr.msk.bf16.gmra.mrb[8].mxu0 %vm812_vm0, %v2805_v46  ;;  %2957 = vpow2.f32 %v2313_v10  ;;  %v651_v23 = vmul.f32 %v2936_v18, %v3375_v29  ;;  %v2812_v29 = vld [vmem:[%s3968_s3 + $0x10] sm:$0xff]   ;;  %v2821_v0 = vld [vmem:[%s3968_s3 + $0x8] sm:$0xff]  }
  0xd4   : > { %v2940_v12 = vpop.eup %2939  ;;  %2704 = vmatprep.subr.bf16.mxu0 %v673_v35  ;;  %v675_v8 = vpack.c.bf16 %v654_v50, %v653_v48  ;;  %2676 = vmatprep.mubr.msk.bf16.mxu0 %vm812_vm0, %v2807_v60  ;;  %v652_v30 = vmul.f32 %v2938_v15, %v3385_v26  ;;  %v2822_v60 = vld [vmem:[%s3968_s3 + $0x8] sm:$0xff]   ;;  %v2824_v18 = vld [vmem:[%s3968_s3 + $0x10] sm:$0xff]   ;;  %v2828_v48 = vld [vmem:[%s3968_s3 + $0x20] sm:$0xff]  }
  0xd5   : > { %v2942_v32 = vpop.eup %2941  ;;  %2669 = vmatmul.mubr.msk.bf16.gmra.mrb[8].mxu1 %vm812_vm0, %v2806_v17  ;;  %v655_v33 = vmul.f32 %v2940_v12, %v3390_v45  ;;  %v2829_v50 = vld [vmem:[%s3968_s3 + $0x28] sm:$0xff]   ;;  %v2832_v12 = vld [vmem:[%s3968_s3] sm:$0xff]  }
  0xd6   : > { %v2944_v55 = vpop.eup %2943  ;;  %2720 = vmatprep.subr.bf16.mxu1 %v675_v8  ;;  %2692 = vmatprep.mubr.msk.bf16.mxu1 %vm812_vm0, %v2808_v7  ;;  %v656_v1 = vmul.f32 %v2942_v32, %v3402_v22  ;;  %v674_v5 = vpack.c.bf16 %v652_v30, %v651_v23  ;;  %v2831_v7 = vld [vmem:[%s3968_s3] sm:$0xff]   ;;  %v2830_v15 = vld [vmem:[%s3968_s3 + $0x28] sm:$0xff]   ;;  %v2835_v32 = vld [vmem:[%s3968_s3 + $0x10] sm:$0xff]  }
  0xd7   : > { %v2946_v57 = vpop.eup %2945  ;;  %v657_v39 = vmul.f32 %v2944_v55, %v3198_v62  ;;  %v2814_v62 = vld [vmem:[%s3968_s3 + $0x18] sm:$0xff]   ;;  %v2834_v55 = vld [vmem:[%s3968_s3 + $0x8] sm:$0xff]   ;;  %v2839_v23 = vld [vmem:[%s3968_s3 + $0x20] sm:$0xff]  }
  0xd8   : > { %v2948_v31 = vpop.eup %2947  ;;  %v565_v27 = vadd.f32 1.0, %v2946_v57  ;;  %v676_v22 = vpack.c.bf16 %v656_v1, %v655_v33  ;;  %v2836_v57 = vld [vmem:[%s3968_s3 + $0x10] sm:$0xff]   ;;  %v2838_v30 = vld [vmem:[%s3968_s3 + $0x18] sm:$0xff]  }
  0xd9   : > { %v2950_v24 = vpop.eup %2949  ;;  %v566_v41 = vadd.f32 1.0, %v2948_v31  ;;  %v2840_v31 = vld [vmem:[%s3968_s3 + $0x20] sm:$0xff]  }
  0xda   : > { %v2952_v52 = vpop.eup %2951  ;;  %2959 = vrcp.f32 %v565_v27  ;;  %v658_v13 = vmul.f32 %v2950_v24, %v3424_v36  ;;  %v2813_v36 = vld [vmem:[%s3968_s3 + $0x18] sm:$0xff]   ;;  %v2841_v27 = vld [vmem:[%s3968_s3 + $0x28] sm:$0xff]  }
  0xdb   : > { %v2954_v26 = vpop.eup %2953  ;;  %2677 = vmatmul.mubr.msk.bf16.vlgmr.msra.gmra.mrb[12].mxu0 %vm812_vm0, %v2809_v9  ;;  %2961 = vrcp.f32 %v566_v41  ;;  %v563_v56 = vadd.f32 1.0, %v2952_v52  ;;  %v2837_v9 = vld [vmem:[%s3968_s3 + $0x18] sm:$0xff]   ;;  %v2326_v41 = vld [vmem:[%s3250_s26 + $0x20] sm:$0xff] }
  0xdc   : > { %v2956_v42 = vpop.eup %2955  ;;  %2705 = vmatpush3.bf16.msra.mxu0 %v673_v35  ;;  %2680 = vmatprep.mubr.msk.bf16.mxu0 %vm812_vm0, %v2811_v25  ;;  %v564_v16 = vadd.f32 1.0, %v2954_v26  ;;  %v677_v54 = vpack.c.bf16 %v658_v13, %v657_v39  ;;  %v2826_v35 = vld [vmem:[%s3968_s3 + $0x18] sm:$0xff]   ;;  %v2842_v25 = vld [vmem:[%s3968_s3 + $0x28] sm:$0xff]  }
  0xdd   : > { %v2958_v45 = vpop.eup %2957  ;;  %2693 = vmatmul.mubr.msk.bf16.vlgmr.msra.gmra.mrb[12].mxu1 %vm812_vm0, %v2810_v14  ;;  %2706 = vmatprep.subr.bf16.mxu0 %v674_v5  ;;  %v567_v59 = vadd.f32 1.0, %v2956_v42  ;;  %2963 = vrcp.f32 %v563_v56  ;;  %v2328_v14 = vld [vmem:[%s3250_s26 + $0x30] sm:$0xff]  ;;  %v2329_v13 = vld [vmem:[%s3250_s26 + $0x38] sm:$0xff] }
  0xde   : > { %2721 = vmatpush3.bf16.msra.mxu1 %v675_v8  ;;  %2696 = vmatprep.mubr.msk.bf16.mxu1 %vm812_vm0, %v2812_v29  ;;  %v568_v53 = vadd.f32 1.0, %v2958_v45  ;;  %2965 = vrcp.f32 %v564_v16  ;;  %v2833_v8 = vld [vmem:[%s3968_s3 + $0x8] sm:$0xff]   ;;  %v2356_v29 = vld [vmem:[%s3250_s26 + $0x50] sm:$0xff] }
  0xdf   : > { %2722 = vmatprep.subr.bf16.mxu1 %v676_v22  ;;  %2967 = vrcp.f32 %v567_v59  ;;  %v2327_v16 = vld [vmem:[%s3250_s26 + $0x28] sm:$0xff]  ;;  %v2357_v59 = vld [vmem:[%s3250_s26 + $0x58] sm:$0xff] }
  0xe0   : > { %2707 = vmatpush3.bf16.msra.mxu0 %v674_v5  ;;  %2969 = vrcp.f32 %v568_v53 }
  0xe1   : > { %2736 = vmatprep.subr.bf16.mxu0 %v677_v54 }
  0xe2   : > { %2723 = vmatpush3.bf16.msra.mxu1 %v676_v22  ;;  %v2354_v22 = vld [vmem:[%s3250_s26 + $0x40] sm:$0xff] }
  0xe3   : > { %2681 = vmatmul.mubr.msk.bf16.gmra.mrb[16].mxu0 %vm812_vm0, %v2813_v36 }
  0xe4   : > { %v2960_v11 = vpop.eup %2959  ;;  %2684 = vmatprep.mubr.msk.bf16.mxu0 %vm812_vm0, %v2815_v63 }
  0xe5   : > { %v2962_v19 = vpop.eup %2961  ;;  %2697 = vmatmul.mubr.msk.bf16.gmra.mrb[16].mxu1 %vm812_vm0, %v2814_v62  ;;  %v661_v20 = vmul.f32 %v2960_v11, %v3443_v61  ;;  %v2820_v61 = vld [vmem:[%s3968_s3] sm:$0xff]  }
  0xe6   : > { %v662_v37 = vmul.f32 %v2962_v19, %v3470_v58  ;;  %2700 = vmatprep.mubr.msk.bf16.mxu1 %vm812_vm0, %v2816_v47  ;;  %v2355_v47 = vld [vmem:[%s3250_s26 + $0x48] sm:$0xff] }
  0xe7   : > { %v2964_v58 = vpop.eup %2963 }
  0xe8   : > { %v679_v44 = vpack.c.bf16 %v662_v37, %v661_v20  ;;  %v2966_v40 = vpop.eup %2965  ;;  %v659_v38 = vmul.f32 %v2964_v58, %v3484_v28  ;;  %v910_v20 = vld [vmem:[%s3250_s26 + $0x10] sm:$0xff] }
  0xe9   : > { %v2968_v46 = vpop.eup %2967  ;;  %v660_v34 = vmul.f32 %v2966_v40, %v3496_v4  ;;  %v911_v40 = vld [vmem:[%s3250_s26 + $0x18] sm:$0xff] }
  0xea   : > { %2752 = vmatprep.subr.bf16.mxu1 %v679_v44  ;;  %v2970_v10 = vpop.eup %2969  ;;  %v663_v21 = vmul.f32 %v2968_v46, %v3506_v43  ;;  %v2825_v43 = vld [vmem:[%s3968_s3 + $0x18] sm:$0xff]  }
  0xeb   : > { %2685 = vmatmul.mubr.msk.bf16.gmra.mrb[20].mxu0 %vm812_vm0, %v2817_v2  ;;  %v664_v17 = vmul.f32 %v2970_v10, %v3513_v51  ;;  %v678_v28 = vpack.c.bf16 %v660_v34, %v659_v38  ;;  %v2827_v51 = vld [vmem:[%s3968_s3 + $0x20] sm:$0xff]  }
  0xec   : > { %2708 = vmatprep.mubr.msk.bf16.mxu0 %vm812_vm0, %v2819_v6 }
  0xed   : > { %2701 = vmatmul.mubr.msk.bf16.gmra.mrb[20].mxu1 %vm812_vm0, %v2818_v3  ;;  %v680_v4 = vpack.c.bf16 %v664_v17, %v663_v21 }
  0xee   : > { %2724 = vmatprep.mubr.msk.bf16.mxu1 %vm812_vm0, %v2820_v61 }
  0xf3   : > { %2709 = vmatmul.mubr.msk.bf16.vlgmr.msra.gmra.mrb[24].mxu0 %vm812_vm0, %v2821_v0 }
  0xf4   : > { %2737 = vmatpush3.bf16.msra.mxu0 %v677_v54  ;;  %2712 = vmatprep.mubr.msk.bf16.mxu0 %vm812_vm0, %v2823_v49  ;;  %v909_v49 = vld [vmem:[%s3250_s26 + $0x8] sm:$0xff] }
  0xf5   : > { %2725 = vmatmul.mubr.msk.bf16.vlgmr.msra.gmra.mrb[24].mxu1 %vm812_vm0, %v2822_v60  ;;  %2738 = vmatprep.subr.bf16.mxu0 %v678_v28 }
  0xf6   : > { %2753 = vmatpush3.bf16.msra.mxu1 %v679_v44  ;;  %2728 = vmatprep.mubr.msk.bf16.mxu1 %vm812_vm0, %v2824_v18  ;;  %v908_v44 = vld [vmem:[%s3250_s26] sm:$0xff] }
  0xf7   : > { %2754 = vmatprep.subr.bf16.mxu1 %v680_v4 }
  0xf8   : > { %2739 = vmatpush3.bf16.msra.mxu0 %v678_v28 }
  0xfa   : > { %2755 = vmatpush3.bf16.msra.mxu1 %v680_v4 }
  0xfb   : > { %2713 = vmatmul.mubr.msk.bf16.gmra.mrb[28].mxu0 %vm812_vm0, %v2825_v43 }
  0xfc   : > { %2716 = vmatprep.mubr.msk.bf16.mxu0 %vm812_vm0, %v2827_v51 }
  0xfd   : > { %2729 = vmatmul.mubr.msk.bf16.gmra.mrb[28].mxu1 %vm812_vm0, %v2826_v35 }
  0xfe   : > { %2732 = vmatprep.mubr.msk.bf16.mxu1 %vm812_vm0, %v2828_v48 }
 0x103   : > { %2717 = vmatmul.mubr.msk.bf16.gmra.mrb[32].mxu0 %vm812_vm0, %v2829_v50 }
 0x104   : > { %2740 = vmatprep.mubr.msk.bf16.mxu0 %vm812_vm0, %v2831_v7 }
 0x105   : > { %2733 = vmatmul.mubr.msk.bf16.gmra.mrb[32].mxu1 %vm812_vm0, %v2830_v15 }
 0x106   : > { %2756 = vmatprep.mubr.msk.bf16.mxu1 %vm812_vm0, %v2832_v12 }
 0x10b   : > { %2741 = vmatmul.mubr.msk.bf16.vlgmr.msra.gmra.mrb[36].mxu0 %vm812_vm0, %v2833_v8 }
 0x10c   : > { %2744 = vmatprep.mubr.msk.bf16.mxu0 %vm812_vm0, %v2835_v32 }
 0x10d   : > { %2757 = vmatmul.mubr.msk.bf16.vlgmr.msra.gmra.mrb[36].mxu1 %vm812_vm0, %v2834_v55 }
 0x10e   : > { %2760 = vmatprep.mubr.msk.bf16.mxu1 %vm812_vm0, %v2836_v57 }
 0x113   : > { %2745 = vmatmul.mubr.msk.bf16.gmra.mrb[40].mxu0 %vm812_vm0, %v2837_v9 }
 0x114   : > { %2748 = vmatprep.mubr.msk.bf16.mxu0 %vm812_vm0, %v2839_v23 }
 0x115   : > { %2761 = vmatmul.mubr.msk.bf16.gmra.mrb[40].mxu1 %vm812_vm0, %v2838_v30 }
 0x116   : > { %2764 = vmatprep.mubr.msk.bf16.mxu1 %vm812_vm0, %v2840_v31 }
 0x11b   : > { %2749 = vmatmul.mubr.msk.bf16.gmra.mrb[44].mxu0 %vm812_vm0, %v2841_v27 }
 0x11d   : > { %2765 = vmatmul.mubr.msk.bf16.gmra.mrb[44].mxu1 %vm812_vm0, %v2842_v25 }
 0x196   : > { %v2646_v24 = vpop.f32.mrb[0].mxu0 }
 0x197   : > { %v927_v33 = vadd.f32 %v2646_v24, %v2328_v14  ;;  %v865_v1 = vpop.f32.mrb[1].mxu0  ;;  %v2384_v14 = vld [vmem:[%s3250_s26 + $0x70] sm:$0xff] }
 0x198   : > { %v2662_v52 = vpop.f32.mrb[0].mxu1  ;;  %v925_v26 = vadd.f32 %v2326_v41, %v865_v1  ;;  %v2647_v5 = vpop.f32.mrb[2].mxu0  ;;  %v2382_v41 = vld [vmem:[%s3250_s26 + $0x60] sm:$0xff] }
 0x199   : > { %2332 = vst.msk [vmem:[%s3250_s26 + $0x30] sm:$0xff] %vm737_vm1, %v927_v33  ;;  %v1093_v42 = vadd.f32 %v2662_v52, %v2356_v29  ;;  %v1027_v45 = vpop.f32.mrb[1].mxu1  ;;  %v928_v39 = vadd.f32 %v2647_v5, %v2329_v13  ;;  %v868_v56 = vpop.f32.mrb[3].mxu0  ;;  %v2420_v29 = vld [vmem:[%s3250_s26 + $0x90] sm:$0xff]  ;;  %v2385_v13 = vld [vmem:[%s3250_s26 + $0x78] sm:$0xff] }
 0x19a   : > { %2330 = vst.msk [vmem:[%s3250_s26 + $0x20] sm:$0xff] %vm737_vm1, %v925_v26  ;;  %v1091_v54 = vadd.f32 %v2354_v22, %v1027_v45  ;;  %v2663_v36 = vpop.f32.mrb[2].mxu1  ;;  %v926_v63 = vadd.f32 %v2327_v16, %v868_v56  ;;  %v2418_v22 = vld [vmem:[%s3250_s26 + $0x80] sm:$0xff]  ;;  %v2383_v16 = vld [vmem:[%s3250_s26 + $0x68] sm:$0xff] }
 0x19b   : > { %2360 = vst.msk [vmem:[%s3250_s26 + $0x50] sm:$0xff] %vm737_vm1, %v1093_v42  ;;  %2333 = vst.msk [vmem:[%s3250_s26 + $0x38] sm:$0xff] %vm737_vm1, %v928_v39  ;;  %v1094_v53 = vadd.f32 %v2663_v36, %v2357_v59  ;;  %v1030_v62 = vpop.f32.mrb[3].mxu1  ;;  %v2421_v59 = vld [vmem:[%s3250_s26 + $0x98] sm:$0xff] }
 0x19c   : > { %2358 = vst.msk [vmem:[%s3250_s26 + $0x40] sm:$0xff] %vm737_vm1, %v1091_v54  ;;  %2331 = vst.msk [vmem:[%s3250_s26 + $0x28] sm:$0xff] %vm737_vm1, %v926_v63  ;;  %v1092_v11 = vadd.f32 %v2355_v47, %v1030_v62  ;;  %v2419_v47 = vld [vmem:[%s3250_s26 + $0x88] sm:$0xff] }
 0x19d   : > { %2361 = vst.msk [vmem:[%s3250_s26 + $0x58] sm:$0xff] %vm737_vm1, %v1094_v53 }
 0x19e   : > { %2359 = vst.msk [vmem:[%s3250_s26 + $0x48] sm:$0xff] %vm737_vm1, %v1092_v11  ;;  %v2650_v19 = vpop.f32.mrb[4].mxu0 }
 0x19f   : > { %v914_v37 = vadd.f32 %v2650_v19, %v910_v20  ;;  %v881_v2 = vpop.f32.mrb[5].mxu0 }
 0x1a0   : > { %v2666_v6 = vpop.f32.mrb[4].mxu1  ;;  %v2348_v3 = vld [vmem:[%s3250_s26 + $0x30] sm:$0xff]  ;;  %v912_v61 = vadd.f32 %v908_v44, %v881_v2  ;;  %v2651_v58 = vpop.f32.mrb[6].mxu0 }
 0x1a1   : > { %918 = vst.msk [vmem:[%s3250_s26 + $0x10] sm:$0xff] %vm737_vm1, %v914_v37  ;;  %v1080_v46 = vadd.f32 %v2666_v6, %v2348_v3  ;;  %v1043_v10 = vpop.f32.mrb[5].mxu1  ;;  %v2346_v0 = vld [vmem:[%s3250_s26 + $0x20] sm:$0xff]  ;;  %v915_v38 = vadd.f32 %v2651_v58, %v911_v40  ;;  %v884_v34 = vpop.f32.mrb[7].mxu0 }
 0x1a2   : > { %916 = vst.msk [vmem:[%s3250_s26] sm:$0xff] %vm737_vm1, %v912_v61  ;;  %v1078_v60 = vadd.f32 %v2346_v0, %v1043_v10  ;;  %v2667_v21 = vpop.f32.mrb[6].mxu1  ;;  %v2349_v17 = vld [vmem:[%s3250_s26 + $0x38] sm:$0xff]  ;;  %v913_v18 = vadd.f32 %v909_v49, %v884_v34  ;;  %v2376_v20 = vld [vmem:[%s3250_s26 + $0x50] sm:$0xff] }
 0x1a3   : > { %2352 = vst.msk [vmem:[%s3250_s26 + $0x30] sm:$0xff] %vm737_vm1, %v1080_v46  ;;  %919 = vst.msk [vmem:[%s3250_s26 + $0x18] sm:$0xff] %vm737_vm1, %v915_v38  ;;  %v1081_v28 = vadd.f32 %v2667_v21, %v2349_v17  ;;  %v1046_v4 = vpop.f32.mrb[7].mxu1  ;;  %v2347_v43 = vld [vmem:[%s3250_s26 + $0x28] sm:$0xff]  ;;  %v2374_v44 = vld [vmem:[%s3250_s26 + $0x40] sm:$0xff] }
 0x1a4   : > { %2350 = vst.msk [vmem:[%s3250_s26 + $0x20] sm:$0xff] %vm737_vm1, %v1078_v60  ;;  %917 = vst.msk [vmem:[%s3250_s26 + $0x8] sm:$0xff] %vm737_vm1, %v913_v18  ;;  %v1079_v51 = vadd.f32 %v2347_v43, %v1046_v4  ;;  %v2377_v40 = vld [vmem:[%s3250_s26 + $0x58] sm:$0xff] }
 0x1a5   : > { %2353 = vst.msk [vmem:[%s3250_s26 + $0x38] sm:$0xff] %vm737_vm1, %v1081_v28  ;;  %v2375_v49 = vld [vmem:[%s3250_s26 + $0x48] sm:$0xff] }
 0x1a6   : > { %2351 = vst.msk [vmem:[%s3250_s26 + $0x28] sm:$0xff] %vm737_vm1, %v1079_v51  ;;  %v2654_v35 = vpop.f32.mrb[8].mxu0 }
 0x1a7   : > { %v897_v48 = vpop.f32.mrb[9].mxu0 }
 0x1a8   : > { %v2670_v50 = vpop.f32.mrb[8].mxu1  ;;  %v1101_v7 = vld [vmem:[%s3250_s26 + $0x10] sm:$0xff]  ;;  %v2655_v15 = vpop.f32.mrb[10].mxu0 }
 0x1a9   : > { %v1105_v12 = vadd.f32 %v2670_v50, %v1101_v7  ;;  %v1059_v8 = vpop.f32.mrb[9].mxu1  ;;  %v1099_v32 = vld [vmem:[%s3250_s26] sm:$0xff]  ;;  %v899_v55 = vpop.f32.mrb[11].mxu0 }
 0x1aa   : > { %v1103_v57 = vadd.f32 %v1099_v32, %v1059_v8  ;;  %v2671_v9 = vpop.f32.mrb[10].mxu1  ;;  %v1102_v23 = vld [vmem:[%s3250_s26 + $0x18] sm:$0xff]  ;;  %v2392_v48 = vld [vmem:[%s3250_s26 + $0x30] sm:$0xff] }
 0x1ab   : > { %1109 = vst.msk [vmem:[%s3250_s26 + $0x10] sm:$0xff] %vm737_vm1, %v1105_v12  ;;  %v1106_v30 = vadd.f32 %v2671_v9, %v1102_v23  ;;  %v1062_v31 = vpop.f32.mrb[11].mxu1  ;;  %v1100_v27 = vld [vmem:[%s3250_s26 + $0x8] sm:$0xff]  ;;  %v2390_v15 = vld [vmem:[%s3250_s26 + $0x20] sm:$0xff] }
 0x1ac   : > { %1107 = vst.msk [vmem:[%s3250_s26] sm:$0xff] %vm737_vm1, %v1103_v57  ;;  %v1104_v25 = vadd.f32 %v1100_v27, %v1062_v31  ;;  %v2393_v57 = vld [vmem:[%s3250_s26 + $0x38] sm:$0xff] }
 0x1ad   : > { %1110 = vst.msk [vmem:[%s3250_s26 + $0x18] sm:$0xff] %vm737_vm1, %v1106_v30 }
 0x1ae   : > { %1108 = vst.msk [vmem:[%s3250_s26 + $0x8] sm:$0xff] %vm737_vm1, %v1104_v25  ;;  %v2678_v24 = vpop.f32.mrb[12].mxu0  ;;  %v2391_v25 = vld [vmem:[%s3250_s26 + $0x28] sm:$0xff] }
 0x1af   : > { %v1271_v33 = vadd.f32 %v2678_v24, %v2384_v14  ;;  %v1205_v1 = vpop.f32.mrb[13].mxu0 }
 0x1b0   : > { %v2694_v52 = vpop.f32.mrb[12].mxu1  ;;  %v1269_v26 = vadd.f32 %v2382_v41, %v1205_v1  ;;  %v2679_v5 = vpop.f32.mrb[14].mxu0 }
 0x1b1   : > { %2388 = vst.msk [vmem:[%s3250_s26 + $0x70] sm:$0xff] %vm737_vm1, %v1271_v33  ;;  %v1449_v42 = vadd.f32 %v2694_v52, %v2420_v29  ;;  %v1383_v45 = vpop.f32.mrb[13].mxu1  ;;  %v1272_v39 = vadd.f32 %v2679_v5, %v2385_v13  ;;  %v1208_v56 = vpop.f32.mrb[15].mxu0  ;;  %v2456_v13 = vld [vmem:[%s3250_s26 + $0xb0] sm:$0xff] }
 0x1b2   : > { %2386 = vst.msk [vmem:[%s3250_s26 + $0x60] sm:$0xff] %vm737_vm1, %v1269_v26  ;;  %v1447_v54 = vadd.f32 %v2418_v22, %v1383_v45  ;;  %v2695_v36 = vpop.f32.mrb[14].mxu1  ;;  %v1270_v63 = vadd.f32 %v2383_v16, %v1208_v56  ;;  %v2454_v22 = vld [vmem:[%s3250_s26 + $0xa0] sm:$0xff]  ;;  %v2492_v56 = vld [vmem:[%s3250_s26 + $0xd0] sm:$0xff] }
 0x1b3   : > { %2424 = vst.msk [vmem:[%s3250_s26 + $0x90] sm:$0xff] %vm737_vm1, %v1449_v42  ;;  %2389 = vst.msk [vmem:[%s3250_s26 + $0x78] sm:$0xff] %vm737_vm1, %v1272_v39  ;;  %v1450_v53 = vadd.f32 %v2695_v36, %v2421_v59  ;;  %v1386_v62 = vpop.f32.mrb[15].mxu1  ;;  %v2457_v36 = vld [vmem:[%s3250_s26 + $0xb8] sm:$0xff] }
 0x1b4   : > { %2422 = vst.msk [vmem:[%s3250_s26 + $0x80] sm:$0xff] %vm737_vm1, %v1447_v54  ;;  %2387 = vst.msk [vmem:[%s3250_s26 + $0x68] sm:$0xff] %vm737_vm1, %v1270_v63  ;;  %v1448_v11 = vadd.f32 %v2419_v47, %v1386_v62 }
 0x1b5   : > { %2425 = vst.msk [vmem:[%s3250_s26 + $0x98] sm:$0xff] %vm737_vm1, %v1450_v53  ;;  %v2490_v53 = vld [vmem:[%s3250_s26 + $0xc0] sm:$0xff] }
 0x1b6   : > { %2423 = vst.msk [vmem:[%s3250_s26 + $0x88] sm:$0xff] %vm737_vm1, %v1448_v11  ;;  %v2682_v19 = vpop.f32.mrb[16].mxu0  ;;  %v2455_v11 = vld [vmem:[%s3250_s26 + $0xa8] sm:$0xff] }
 0x1b7   : > { %v1258_v37 = vadd.f32 %v2682_v19, %v2376_v20  ;;  %v1221_v2 = vpop.f32.mrb[17].mxu0 }
 0x1b8   : > { %v2698_v6 = vpop.f32.mrb[16].mxu1  ;;  %v2412_v3 = vld [vmem:[%s3250_s26 + $0x70] sm:$0xff]  ;;  %v1256_v61 = vadd.f32 %v2374_v44, %v1221_v2  ;;  %v2683_v58 = vpop.f32.mrb[18].mxu0 }
 0x1b9   : > { %2380 = vst.msk [vmem:[%s3250_s26 + $0x50] sm:$0xff] %vm737_vm1, %v1258_v37  ;;  %v1436_v46 = vadd.f32 %v2698_v6, %v2412_v3  ;;  %v1399_v10 = vpop.f32.mrb[17].mxu1  ;;  %v2410_v0 = vld [vmem:[%s3250_s26 + $0x60] sm:$0xff]  ;;  %v1259_v38 = vadd.f32 %v2683_v58, %v2377_v40  ;;  %v1224_v34 = vpop.f32.mrb[19].mxu0  ;;  %v2493_v37 = vld [vmem:[%s3250_s26 + $0xd8] sm:$0xff]  ;;  %v2491_v3 = vld [vmem:[%s3250_s26 + $0xc8] sm:$0xff] }
 0x1ba   : > { %2378 = vst.msk [vmem:[%s3250_s26 + $0x40] sm:$0xff] %vm737_vm1, %v1256_v61  ;;  %v1434_v60 = vadd.f32 %v2410_v0, %v1399_v10  ;;  %v2699_v21 = vpop.f32.mrb[18].mxu1  ;;  %v2413_v17 = vld [vmem:[%s3250_s26 + $0x78] sm:$0xff]  ;;  %v1257_v18 = vadd.f32 %v2375_v49, %v1224_v34  ;;  %v2448_v40 = vld [vmem:[%s3250_s26 + $0x90] sm:$0xff] }
 0x1bb   : > { %2416 = vst.msk [vmem:[%s3250_s26 + $0x70] sm:$0xff] %vm737_vm1, %v1436_v46  ;;  %2381 = vst.msk [vmem:[%s3250_s26 + $0x58] sm:$0xff] %vm737_vm1, %v1259_v38  ;;  %v1437_v28 = vadd.f32 %v2699_v21, %v2413_v17  ;;  %v1402_v4 = vpop.f32.mrb[19].mxu1  ;;  %v2411_v43 = vld [vmem:[%s3250_s26 + $0x68] sm:$0xff]  ;;  %v2446_v0 = vld [vmem:[%s3250_s26 + $0x80] sm:$0xff] }
 0x1bc   : > { %2414 = vst.msk [vmem:[%s3250_s26 + $0x60] sm:$0xff] %vm737_vm1, %v1434_v60  ;;  %2379 = vst.msk [vmem:[%s3250_s26 + $0x48] sm:$0xff] %vm737_vm1, %v1257_v18  ;;  %v1435_v51 = vadd.f32 %v2411_v43, %v1402_v4  ;;  %v2449_v21 = vld [vmem:[%s3250_s26 + $0x98] sm:$0xff] }
 0x1bd   : > { %2417 = vst.msk [vmem:[%s3250_s26 + $0x78] sm:$0xff] %vm737_vm1, %v1437_v28 }
 0x1be   : > { %2415 = vst.msk [vmem:[%s3250_s26 + $0x68] sm:$0xff] %vm737_vm1, %v1435_v51  ;;  %v2686_v35 = vpop.f32.mrb[20].mxu0  ;;  %v2447_v51 = vld [vmem:[%s3250_s26 + $0x88] sm:$0xff] }
 0x1bf   : > { %v1283_v50 = vadd.f32 %v2686_v35, %v2392_v48  ;;  %v1237_v7 = vpop.f32.mrb[21].mxu0 }
 0x1c0   : > { %v2702_v12 = vpop.f32.mrb[20].mxu1  ;;  %v2428_v8 = vld [vmem:[%s3250_s26 + $0x50] sm:$0xff]  ;;  %v1281_v32 = vadd.f32 %v2390_v15, %v1237_v7  ;;  %v2687_v55 = vpop.f32.mrb[22].mxu0 }
 0x1c1   : > { %2396 = vst.msk [vmem:[%s3250_s26 + $0x30] sm:$0xff] %vm737_vm1, %v1283_v50  ;;  %v1461_v9 = vadd.f32 %v2702_v12, %v2428_v8  ;;  %v1415_v23 = vpop.f32.mrb[21].mxu1  ;;  %v2426_v30 = vld [vmem:[%s3250_s26 + $0x40] sm:$0xff]  ;;  %v1284_v31 = vadd.f32 %v2687_v55, %v2393_v57  ;;  %v1240_v27 = vpop.f32.mrb[23].mxu0 }
 0x1c2   : > { %2394 = vst.msk [vmem:[%s3250_s26 + $0x20] sm:$0xff] %vm737_vm1, %v1281_v32  ;;  %v1459_v24 = vadd.f32 %v2426_v30, %v1415_v23  ;;  %v2703_v14 = vpop.f32.mrb[22].mxu1  ;;  %v2429_v33 = vld [vmem:[%s3250_s26 + $0x58] sm:$0xff]  ;;  %v1282_v1 = vadd.f32 %v2391_v25, %v1240_v27  ;;  %v2464_v57 = vld [vmem:[%s3250_s26 + $0x70] sm:$0xff] }
 0x1c3   : > { %2432 = vst.msk [vmem:[%s3250_s26 + $0x50] sm:$0xff] %vm737_vm1, %v1461_v9  ;;  %2397 = vst.msk [vmem:[%s3250_s26 + $0x38] sm:$0xff] %vm737_vm1, %v1284_v31  ;;  %v1462_v41 = vadd.f32 %v2703_v14, %v2429_v33  ;;  %v1418_v52 = vpop.f32.mrb[23].mxu1  ;;  %v2427_v29 = vld [vmem:[%s3250_s26 + $0x48] sm:$0xff]  ;;  %v2462_v30 = vld [vmem:[%s3250_s26 + $0x60] sm:$0xff] }
 0x1c4   : > { %2430 = vst.msk [vmem:[%s3250_s26 + $0x40] sm:$0xff] %vm737_vm1, %v1459_v24  ;;  %2395 = vst.msk [vmem:[%s3250_s26 + $0x28] sm:$0xff] %vm737_vm1, %v1282_v1  ;;  %v1460_v26 = vadd.f32 %v2427_v29, %v1418_v52  ;;  %v2465_v14 = vld [vmem:[%s3250_s26 + $0x78] sm:$0xff] }
 0x1c5   : > { %2433 = vst.msk [vmem:[%s3250_s26 + $0x58] sm:$0xff] %vm737_vm1, %v1462_v41 }
 0x1c6   : > { %2431 = vst.msk [vmem:[%s3250_s26 + $0x48] sm:$0xff] %vm737_vm1, %v1460_v26  ;;  %v2710_v5 = vpop.f32.mrb[24].mxu0  ;;  %v2463_v26 = vld [vmem:[%s3250_s26 + $0x68] sm:$0xff] }
 0x1c7   : > { %v1627_v42 = vadd.f32 %v2710_v5, %v2456_v13  ;;  %v1561_v45 = vpop.f32.mrb[25].mxu0 }
 0x1c8   : > { %v2726_v39 = vpop.f32.mrb[24].mxu1  ;;  %v1625_v16 = vadd.f32 %v2454_v22, %v1561_v45  ;;  %v2711_v54 = vpop.f32.mrb[26].mxu0 }
 0x1c9   : > { %2460 = vst.msk [vmem:[%s3250_s26 + $0xb0] sm:$0xff] %vm737_vm1, %v1627_v42  ;;  %v1805_v59 = vadd.f32 %v2726_v39, %v2492_v56  ;;  %v1739_v63 = vpop.f32.mrb[25].mxu1  ;;  %v1628_v62 = vadd.f32 %v2711_v54, %v2457_v36  ;;  %v1564_v47 = vpop.f32.mrb[27].mxu0  ;;  %v2528_v36 = vld [vmem:[%s3250_s26 + $0xf0] sm:$0xff] }
 0x1ca   : > { %2458 = vst.msk [vmem:[%s3250_s26 + $0xa0] sm:$0xff] %vm737_vm1, %v1625_v16  ;;  %v1803_v19 = vadd.f32 %v2490_v53, %v1739_v63  ;;  %v2727_v20 = vpop.f32.mrb[26].mxu1  ;;  %v1626_v2 = vadd.f32 %v2455_v11, %v1564_v47  ;;  %v2526_v53 = vld [vmem:[%s3250_s26 + $0xe0] sm:$0xff] }
 0x1cb   : > { %2496 = vst.msk [vmem:[%s3250_s26 + $0xd0] sm:$0xff] %vm737_vm1, %v1805_v59  ;;  %2461 = vst.msk [vmem:[%s3250_s26 + $0xb8] sm:$0xff] %vm737_vm1, %v1628_v62  ;;  %v1806_v44 = vadd.f32 %v2727_v20, %v2493_v37  ;;  %v1742_v6 = vpop.f32.mrb[27].mxu1 }
 0x1cc   : > { %2494 = vst.msk [vmem:[%s3250_s26 + $0xc0] sm:$0xff] %vm737_vm1, %v1803_v19  ;;  %2459 = vst.msk [vmem:[%s3250_s26 + $0xa8] sm:$0xff] %vm737_vm1, %v1626_v2  ;;  %v1804_v61 = vadd.f32 %v2491_v3, %v1742_v6  ;;  %v2529_v19 = vld [vmem:[%s3250_s26 + $0xf8] sm:$0xff] }
 0x1cd   : > { %2497 = vst.msk [vmem:[%s3250_s26 + $0xd8] sm:$0xff] %vm737_vm1, %v1806_v44  ;;  %v2527_v44 = vld [vmem:[%s3250_s26 + $0xe8] sm:$0xff] }
 0x1ce   : > { %2495 = vst.msk [vmem:[%s3250_s26 + $0xc8] sm:$0xff] %vm737_vm1, %v1804_v61  ;;  %v2714_v58 = vpop.f32.mrb[28].mxu0 }
 0x1cf   : > { %v1614_v46 = vadd.f32 %v2714_v58, %v2448_v40  ;;  %v1577_v10 = vpop.f32.mrb[29].mxu0 }
 0x1d0   : > { %v2730_v38 = vpop.f32.mrb[28].mxu1  ;;  %v2484_v34 = vld [vmem:[%s3250_s26 + $0xb0] sm:$0xff]  ;;  %v1612_v49 = vadd.f32 %v2446_v0, %v1577_v10  ;;  %v2715_v60 = vpop.f32.mrb[30].mxu0 }
 0x1d1   : > { %2452 = vst.msk [vmem:[%s3250_s26 + $0x90] sm:$0xff] %vm737_vm1, %v1614_v46  ;;  %v1792_v17 = vadd.f32 %v2730_v38, %v2484_v34  ;;  %v1755_v18 = vpop.f32.mrb[29].mxu1  ;;  %v2482_v28 = vld [vmem:[%s3250_s26 + $0xa0] sm:$0xff]  ;;  %v1615_v4 = vadd.f32 %v2715_v60, %v2449_v21  ;;  %v1580_v43 = vpop.f32.mrb[31].mxu0 }
 0x1d2   : > { %2450 = vst.msk [vmem:[%s3250_s26 + $0x80] sm:$0xff] %vm737_vm1, %v1612_v49  ;;  %v1790_v35 = vadd.f32 %v2482_v28, %v1755_v18  ;;  %v2731_v48 = vpop.f32.mrb[30].mxu1  ;;  %v2485_v50 = vld [vmem:[%s3250_s26 + $0xb8] sm:$0xff]  ;;  %v1613_v7 = vadd.f32 %v2447_v51, %v1580_v43  ;;  %v2520_v40 = vld [vmem:[%s3250_s26 + $0xd0] sm:$0xff] }
 0x1d3   : > { %2488 = vst.msk [vmem:[%s3250_s26 + $0xb0] sm:$0xff] %vm737_vm1, %v1792_v17  ;;  %2453 = vst.msk [vmem:[%s3250_s26 + $0x98] sm:$0xff] %vm737_vm1, %v1615_v4  ;;  %v1793_v15 = vadd.f32 %v2731_v48, %v2485_v50  ;;  %v1758_v12 = vpop.f32.mrb[31].mxu1  ;;  %v2483_v8 = vld [vmem:[%s3250_s26 + $0xa8] sm:$0xff]  ;;  %v2518_v0 = vld [vmem:[%s3250_s26 + $0xc0] sm:$0xff] }
 0x1d4   : > { %2486 = vst.msk [vmem:[%s3250_s26 + $0xa0] sm:$0xff] %vm737_vm1, %v1790_v35  ;;  %2451 = vst.msk [vmem:[%s3250_s26 + $0x88] sm:$0xff] %vm737_vm1, %v1613_v7  ;;  %v1791_v32 = vadd.f32 %v2483_v8, %v1758_v12  ;;  %v2521_v21 = vld [vmem:[%s3250_s26 + $0xd8] sm:$0xff] }
 0x1d5   : > { %2489 = vst.msk [vmem:[%s3250_s26 + $0xb8] sm:$0xff] %vm737_vm1, %v1793_v15  ;;  %v2519_v51 = vld [vmem:[%s3250_s26 + $0xc8] sm:$0xff] }
 0x1d6   : > { %2487 = vst.msk [vmem:[%s3250_s26 + $0xa8] sm:$0xff] %vm737_vm1, %v1791_v32  ;;  %v2718_v55 = vpop.f32.mrb[32].mxu0 }
 0x1d7   : > { %v1639_v9 = vadd.f32 %v2718_v55, %v2464_v57  ;;  %v1593_v23 = vpop.f32.mrb[33].mxu0 }
 0x1d8   : > { %v2734_v31 = vpop.f32.mrb[32].mxu1  ;;  %v2500_v27 = vld [vmem:[%s3250_s26 + $0x90] sm:$0xff]  ;;  %v1637_v25 = vadd.f32 %v2462_v30, %v1593_v23  ;;  %v2719_v24 = vpop.f32.mrb[34].mxu0 }
 0x1d9   : > { %2468 = vst.msk [vmem:[%s3250_s26 + $0x70] sm:$0xff] %vm737_vm1, %v1639_v9  ;;  %v1817_v33 = vadd.f32 %v2734_v31, %v2500_v27  ;;  %v1771_v1 = vpop.f32.mrb[33].mxu1  ;;  %v2498_v41 = vld [vmem:[%s3250_s26 + $0x80] sm:$0xff]  ;;  %v1640_v52 = vadd.f32 %v2719_v24, %v2465_v14  ;;  %v1596_v29 = vpop.f32.mrb[35].mxu0 }
 0x1da   : > { %2466 = vst.msk [vmem:[%s3250_s26 + $0x60] sm:$0xff] %vm737_vm1, %v1637_v25  ;;  %v1815_v5 = vadd.f32 %v2498_v41, %v1771_v1  ;;  %v2735_v13 = vpop.f32.mrb[34].mxu1  ;;  %v2501_v42 = vld [vmem:[%s3250_s26 + $0x98] sm:$0xff]  ;;  %v1638_v45 = vadd.f32 %v2463_v26, %v1596_v29  ;;  %v2536_v57 = vld [vmem:[%s3250_s26 + $0xb0] sm:$0xff] }
 0x1db   : > { %2504 = vst.msk [vmem:[%s3250_s26 + $0x90] sm:$0xff] %vm737_vm1, %v1817_v33  ;;  %2469 = vst.msk [vmem:[%s3250_s26 + $0x78] sm:$0xff] %vm737_vm1, %v1640_v52  ;;  %v1818_v22 = vadd.f32 %v2735_v13, %v2501_v42  ;;  %v1774_v39 = vpop.f32.mrb[35].mxu1  ;;  %v2499_v56 = vld [vmem:[%s3250_s26 + $0x88] sm:$0xff]  ;;  %v2534_v30 = vld [vmem:[%s3250_s26 + $0xa0] sm:$0xff] }
 0x1dc   : > { %2502 = vst.msk [vmem:[%s3250_s26 + $0x80] sm:$0xff] %vm737_vm1, %v1815_v5  ;;  %2467 = vst.msk [vmem:[%s3250_s26 + $0x68] sm:$0xff] %vm737_vm1, %v1638_v45  ;;  %v1816_v16 = vadd.f32 %v2499_v56, %v1774_v39  ;;  %v2537_v14 = vld [vmem:[%s3250_s26 + $0xb8] sm:$0xff] }
 0x1dd   : > { %2505 = vst.msk [vmem:[%s3250_s26 + $0x98] sm:$0xff] %vm737_vm1, %v1818_v22  ;;  %v2535_v26 = vld [vmem:[%s3250_s26 + $0xa8] sm:$0xff] }
 0x1de   : > { %2503 = vst.msk [vmem:[%s3250_s26 + $0x88] sm:$0xff] %vm737_vm1, %v1816_v16  ;;  %v2742_v54 = vpop.f32.mrb[36].mxu0 }
 0x1df   : > { %v1983_v59 = vadd.f32 %v2742_v54, %v2528_v36  ;;  %v1917_v63 = vpop.f32.mrb[37].mxu0 }
 0x1e0   : > { %v2758_v62 = vpop.f32.mrb[36].mxu1  ;;  %v1981_v47 = vadd.f32 %v2526_v53, %v1917_v63  ;;  %v2743_v11 = vpop.f32.mrb[38].mxu0 }
 0x1e1   : > { %2532 = vst.msk [vmem:[%s3250_s26 + $0xf0] sm:$0xff] %vm737_vm1, %v1983_v59  ;;  %v2095_v20 = vpop.f32.mrb[37].mxu1  ;;  %v1984_v37 = vadd.f32 %v2743_v11, %v2529_v19  ;;  %v1920_v2 = vpop.f32.mrb[39].mxu0 }
 0x1e2   : > { %2530 = vst.msk [vmem:[%s3250_s26 + $0xe0] sm:$0xff] %vm737_vm1, %v1981_v47  ;;  %v2759_v6 = vpop.f32.mrb[38].mxu1  ;;  %v1982_v3 = vadd.f32 %v2527_v44, %v1920_v2 }
 0x1e3   : > { %2533 = vst.msk [vmem:[%s3250_s26 + $0xf8] sm:$0xff] %vm737_vm1, %v1984_v37  ;;  %v2097_v61 = vpop.f32.mrb[39].mxu1 }
 0x1e4   : > { %2531 = vst.msk [vmem:[%s3250_s26 + $0xe8] sm:$0xff] %vm737_vm1, %v1982_v3 }
 0x1e6   : > { %v2746_v58 = vpop.f32.mrb[40].mxu0 }
 0x1e7   : > { %v1970_v46 = vadd.f32 %v2746_v58, %v2520_v40  ;;  %v1933_v10 = vpop.f32.mrb[41].mxu0 }
 0x1e8   : > { %v2762_v38 = vpop.f32.mrb[40].mxu1  ;;  %v2556_v34 = vld [vmem:[%s3250_s26 + $0xf0] sm:$0xff]  ;;  %v1968_v49 = vadd.f32 %v2518_v0, %v1933_v10  ;;  %v2747_v60 = vpop.f32.mrb[42].mxu0 }
 0x1e9   : > { %2524 = vst.msk [vmem:[%s3250_s26 + $0xd0] sm:$0xff] %vm737_vm1, %v1970_v46  ;;  %v2144_v17 = vadd.f32 %v2762_v38, %v2556_v34  ;;  %v2107_v18 = vpop.f32.mrb[41].mxu1  ;;  %v2554_v28 = vld [vmem:[%s3250_s26 + $0xe0] sm:$0xff]  ;;  %v1971_v4 = vadd.f32 %v2747_v60, %v2521_v21  ;;  %v1936_v43 = vpop.f32.mrb[43].mxu0 }
 0x1ea   : > { %2522 = vst.msk [vmem:[%s3250_s26 + $0xc0] sm:$0xff] %vm737_vm1, %v1968_v49  ;;  %v2142_v35 = vadd.f32 %v2554_v28, %v2107_v18  ;;  %v2763_v48 = vpop.f32.mrb[42].mxu1  ;;  %v2557_v50 = vld [vmem:[%s3250_s26 + $0xf8] sm:$0xff]  ;;  %v1969_v7 = vadd.f32 %v2519_v51, %v1936_v43 }
 0x1eb   : > { %2560 = vst.msk [vmem:[%s3250_s26 + $0xf0] sm:$0xff] %vm737_vm1, %v2144_v17  ;;  %2525 = vst.msk [vmem:[%s3250_s26 + $0xd8] sm:$0xff] %vm737_vm1, %v1971_v4  ;;  %v2145_v15 = vadd.f32 %v2763_v48, %v2557_v50  ;;  %v2110_v12 = vpop.f32.mrb[43].mxu1  ;;  %v2555_v8 = vld [vmem:[%s3250_s26 + $0xe8] sm:$0xff] }
 0x1ec   : > { %2558 = vst.msk [vmem:[%s3250_s26 + $0xe0] sm:$0xff] %vm737_vm1, %v2142_v35  ;;  %2523 = vst.msk [vmem:[%s3250_s26 + $0xc8] sm:$0xff] %vm737_vm1, %v1969_v7  ;;  %v2143_v32 = vadd.f32 %v2555_v8, %v2110_v12 }
 0x1ed   : > { %2561 = vst.msk [vmem:[%s3250_s26 + $0xf8] sm:$0xff] %vm737_vm1, %v2145_v15 }
 0x1ee   : > { %2559 = vst.msk [vmem:[%s3250_s26 + $0xe8] sm:$0xff] %vm737_vm1, %v2143_v32  ;;  %v2750_v55 = vpop.f32.mrb[44].mxu0 }
 0x1ef   : > { %v1995_v9 = vadd.f32 %v2750_v55, %v2536_v57  ;;  %v1949_v23 = vpop.f32.mrb[45].mxu0 }
 0x1f0   : > { %v2766_v31 = vpop.f32.mrb[44].mxu1  ;;  %v2564_v27 = vld [vmem:[%s3250_s26 + $0xd0] sm:$0xff]  ;;  %v1993_v25 = vadd.f32 %v2534_v30, %v1949_v23  ;;  %v2751_v24 = vpop.f32.mrb[46].mxu0 }
 0x1f1   : > { %2540 = vst.msk [vmem:[%s3250_s26 + $0xb0] sm:$0xff] %vm737_vm1, %v1995_v9  ;;  %v2156_v33 = vadd.f32 %v2766_v31, %v2564_v27  ;;  %v2123_v1 = vpop.f32.mrb[45].mxu1  ;;  %v2562_v41 = vld [vmem:[%s3250_s26 + $0xc0] sm:$0xff]  ;;  %v1996_v52 = vadd.f32 %v2751_v24, %v2537_v14  ;;  %v1952_v29 = vpop.f32.mrb[47].mxu0 }
 0x1f2   : > { %2538 = vst.msk [vmem:[%s3250_s26 + $0xa0] sm:$0xff] %vm737_vm1, %v1993_v25  ;;  %v2154_v5 = vadd.f32 %v2562_v41, %v2123_v1  ;;  %v2767_v13 = vpop.f32.mrb[46].mxu1  ;;  %v2565_v42 = vld [vmem:[%s3250_s26 + $0xd8] sm:$0xff]  ;;  %v1994_v45 = vadd.f32 %v2535_v26, %v1952_v29 }
 0x1f3   : > { %2568 = vst.msk [vmem:[%s3250_s26 + $0xd0] sm:$0xff] %vm737_vm1, %v2156_v33  ;;  %2541 = vst.msk [vmem:[%s3250_s26 + $0xb8] sm:$0xff] %vm737_vm1, %v1996_v52  ;;  %v2157_v22 = vadd.f32 %v2767_v13, %v2565_v42  ;;  %v2126_v39 = vpop.f32.mrb[47].mxu1  ;;  %v2563_v56 = vld [vmem:[%s3250_s26 + $0xc8] sm:$0xff] }
 0x1f4   : > { %2566 = vst.msk [vmem:[%s3250_s26 + $0xc0] sm:$0xff] %vm737_vm1, %v2154_v5  ;;  %2539 = vst.msk [vmem:[%s3250_s26 + $0xa8] sm:$0xff] %vm737_vm1, %v1994_v45  ;;  %v2155_v16 = vadd.f32 %v2563_v56, %v2126_v39 }
 0x1f5   : > { %2569 = vst.msk [vmem:[%s3250_s26 + $0xd8] sm:$0xff] %vm737_vm1, %v2157_v22 }
 0x1f6   : > { %2567 = vst.msk [vmem:[%s3250_s26 + $0xc8] sm:$0xff] %vm737_vm1, %v2155_v16 }
 0x1f7 PF: > { %s15_s20 = sadd.s32 1, %s2993_s20   ;;  %s3971_s18 = smov %s2989_s19 }
 0x1f8   : > { %p12_p5 = scmp.ge.s32.totalorder %s15_s20, 4   ;;  %s3972_s19 = smov %s3974_s21 }
 0x1fa   :  { %14 = sbr.rel (!%p12_p5) target bundleno = 2 (0x2), region = 83 }

</bundles_post_ra>
